<compile_context>
chip_gen: v6e
topology: v6e:2x2x1
jax: 0.10.0
libtpu: 0.0.40
codegen_flags: <defaults>
</compile_context>

<pallas_src>
import jax
import jax.numpy as jnp
from jax.experimental import pallas as pl
from jax.experimental.pallas import tpu as pltpu


def _round_up(x, m):
    return (x + m - 1) // m * m


def _leaky_relu(x, slope=0.2):
    return jnp.where(x > 0, x, slope * x)


def discriminator_kernel(x_ref,
                         w1_ref, b1_ref,
                         w2_ref, b2_ref,
                         w3_ref, b3_ref,
                         w4_ref, b4_ref,
                         o_ref, acc_ref):
    """One (batch-tile, k-tile) grid step.

    Layer 1 is accumulated over the K grid axis into acc_ref (f32, initialized
    with the layer-1 bias); the rest of the MLP runs once, at the final K step,
    entirely out of VMEM.
    """
    k = pl.program_id(1)

    @pl.when(k == 0)
    def _():
        # Fold b1 into the accumulator init: acc = b1 (broadcast over batch).
        acc_ref[...] = jnp.broadcast_to(b1_ref[...], acc_ref.shape)

    # Layer 1 partial product: (TB, TK) @ (TK, 512) on the MXU, f32 accumulation.
    acc_ref[...] += jnp.dot(x_ref[...], w1_ref[...],
                            preferred_element_type=jnp.float32)

    @pl.when(k == pl.num_programs(1) - 1)
    def _():
        h = _leaky_relu(acc_ref[...])
        h = _leaky_relu(
            jnp.dot(h.astype(jnp.bfloat16), w2_ref[...],
                    preferred_element_type=jnp.float32) + b2_ref[...])
        h = _leaky_relu(
            jnp.dot(h.astype(jnp.bfloat16), w3_ref[...],
                    preferred_element_type=jnp.float32) + b3_ref[...])
        logit = jnp.dot(h.astype(jnp.bfloat16), w4_ref[...],
                        preferred_element_type=jnp.float32) + b4_ref[...]
        # Sigmoid: exp + approximate reciprocal both land on the EUP slot.
        o_ref[...] = pl.reciprocal(1.0 + jnp.exp(-logit), approx=True)


def _vmem_limit_bytes(tb, tk):
    """Actual VMEM footprint (double-buffered inputs/outputs) + headroom."""
    bf16, f32 = 2, 4
    w_bytes = (tk * 512 + 512 * 256 + 256 * 128 + 128 * 128) * bf16
    b_bytes = (512 + 256 + 128 + 128) * f32
    x_tile = tb * tk * bf16
    o_tile = tb * 128 * f32
    acc = tb * 512 * f32
    est = 2 * (w_bytes + b_bytes + x_tile + o_tile) + acc
    return int(min(max(est + (8 << 20), 16 << 20), 48 << 20))


def discriminator_forward(img, params):
    """img: (B, C, H, W) float32.  params: f32 weights stored as (in, out), biases (1, out)."""
    B = img.shape[0]
    x = img.reshape(B, -1).astype(jnp.float32)   # torch .view(B, -1): row-major flatten
    D = x.shape[1]

    # ---- tiling choices --------------------------------------------------
    TB = min(256, _round_up(B, 8))               # batch tile (sublane multiple of 8)
    B_pad = _round_up(B, TB)

    D_128 = _round_up(D, 128)
    TK = D_128 if D_128 <= 2048 else 2048        # stream w1 over K when input is large
    D_pad = _round_up(D_128, TK)

    # ---- pad + cast operands (zero padding does not change the math) -----
    x_p = jnp.zeros((B_pad, D_pad), jnp.bfloat16).at[:B, :D].set(
        x.astype(jnp.bfloat16))

    w1 = jnp.zeros((D_pad, 512), jnp.bfloat16).at[:D, :].set(
        params["w1"].astype(jnp.bfloat16))
    w2 = params["w2"].astype(jnp.bfloat16)
    w3 = params["w3"].astype(jnp.bfloat16)
    # Lane-pad the last layer to 128 output columns -> lane-dense output store.
    w4 = jnp.zeros((128, 128), jnp.bfloat16).at[:, :1].set(
        params["w4"].astype(jnp.bfloat16))
    b1 = params["b1"].astype(jnp.float32)
    b2 = params["b2"].astype(jnp.float32)
    b3 = params["b3"].astype(jnp.float32)
    b4 = jnp.zeros((1, 128), jnp.float32).at[:, :1].set(
        params["b4"].astype(jnp.float32))

    grid = (B_pad // TB, D_pad // TK)

    resident = lambda shape: pl.BlockSpec(shape, lambda i, k: (0, 0))

    flops = 2 * B_pad * (D_pad * 512 + 512 * 256 + 256 * 128 + 128 * 128)
    bytes_accessed = (x_p.size * 2 + w1.size * 2 + w2.size * 2 + w3.size * 2
                      + w4.size * 2 + (b1.size + b2.size + b3.size + b4.size) * 4
                      + B_pad * 128 * 4)

    out = pl.pallas_call(
        discriminator_kernel,
        out_shape=jax.ShapeDtypeStruct((B_pad, 128), jnp.float32),
        grid_spec=pltpu.PrefetchScalarGridSpec(
            num_scalar_prefetch=0,
            grid=grid,
            in_specs=[
                pl.BlockSpec((TB, TK), lambda i, k: (i, k)),   # x (pipelined over batch & K)
                pl.BlockSpec((TK, 512), lambda i, k: (k, 0)),  # w1 (streamed over K)
                resident((1, 512)),                            # b1
                resident((512, 256)), resident((1, 256)),      # w2, b2
                resident((256, 128)), resident((1, 128)),      # w3, b3
                resident((128, 128)), resident((1, 128)),      # w4, b4 (lane-padded)
            ],
            out_specs=pl.BlockSpec((TB, 128), lambda i, k: (i, 0)),
            scratch_shapes=[pltpu.VMEM((TB, 512), jnp.float32)],
        ),
        compiler_params=pltpu.CompilerParams(
            dimension_semantics=("parallel", "arbitrary"),
            vmem_limit_bytes=_vmem_limit_bytes(TB, TK),
        ),
        cost_estimate=pl.CostEstimate(
            flops=flops,
            transcendentals=2 * B_pad * 128,      # exp + reciprocal per output lane
            bytes_accessed=bytes_accessed,
        ),
    )(x_p, w1, b1, w2, b2, w3, b3, w4, b4)

    return out[:B, :1]


def init_params(key, input_size):
    """Deterministic init (PyTorch-Linear-like uniform fan-in scaling).

    Weights are stored transposed relative to torch, i.e. (in, out)."""
    dims = [(input_size, 512), (512, 256), (256, 128), (128, 1)]
    params = {}
    for i, (fan_in, fan_out) in enumerate(dims, start=1):
        key, kw, kb = jax.random.split(key, 3)
        bound = 1.0 / jnp.sqrt(fan_in)
        params[f"w{i}"] = jax.random.uniform(
            kw, (fan_in, fan_out), jnp.float32, -bound, bound)
        params[f"b{i}"] = jax.random.uniform(
            kb, (1, fan_out), jnp.float32, -bound, bound)
    return params


def reference_forward(img, params):
    """Pure-JAX reference mirroring the kernel's bf16 operand precision."""
    x = img.reshape(img.shape[0], -1).astype(jnp.float32)

    def dot_bf16(a, w):
        return jnp.dot(a.astype(jnp.bfloat16).astype(jnp.float32),
                       w.astype(jnp.bfloat16).astype(jnp.float32))

    h = _leaky_relu(dot_bf16(x, params["w1"]) + params["b1"])
    h = _leaky_relu(dot_bf16(h, params["w2"]) + params["b2"])
    h = _leaky_relu(dot_bf16(h, params["w3"]) + params["b3"])
    logit = dot_bf16(h, params["w4"]) + params["b4"]
    return jax.nn.sigmoid(logit)


if __name__ == "__main__":
    key = jax.random.PRNGKey(0)
    k_img, k_par = jax.random.split(key)

    # B=2, C=4, H=W=16  ->  input_size = 1024
    B, C, H, W = 2, 4, 16, 16
    input_size = C * H * W
    img = jax.random.normal(k_img, (B, C, H, W), dtype=jnp.float32)
    params = init_params(k_par, input_size)

    out = jax.block_until_ready(discriminator_forward(img, params))
    ref = reference_forward(img, params)

    assert out.shape == (B, 1), out.shape
    assert jnp.allclose(out, ref, atol=5e-3, rtol=0.0), (out, ref)

    print("KERNEL_OK")
</pallas_src>

<mosaic_0001>
module attributes {stable_mosaic.version = 11 : i64} {
  func.func @discriminator_kernel(%arg0: i32, %arg1: i32, %arg2: memref<8x1024xbf16, #tpu.memory_space<vmem>>, %arg3: memref<1024x512xbf16, #tpu.memory_space<vmem>>, %arg4: memref<1x512xf32, #tpu.memory_space<vmem>>, %arg5: memref<512x256xbf16, #tpu.memory_space<vmem>>, %arg6: memref<1x256xf32, #tpu.memory_space<vmem>>, %arg7: memref<256x128xbf16, #tpu.memory_space<vmem>>, %arg8: memref<1x128xf32, #tpu.memory_space<vmem>>, %arg9: memref<128x128xbf16, #tpu.memory_space<vmem>>, %arg10: memref<1x128xf32, #tpu.memory_space<vmem>>, %arg11: memref<8x128xf32, #tpu.memory_space<vmem>>, %arg12: memref<8x512xf32, #tpu.memory_space<vmem>>) attributes {dimension_semantics = [#tpu.dimension_semantics<parallel>, #tpu.dimension_semantics<arbitrary>], iteration_bounds = array<i64: 1, 1>, scalar_prefetch = 0 : i64, scratch_operands = 1 : i64, tpu.core_type = #tpu.core_type<tc>, window_params = [{transform_indices = @transform_0, window_bounds = array<i64: 8, 1024>}, {transform_indices = @transform_1, window_bounds = array<i64: 1024, 512>}, {pipeline_mode = #tpu.pipeline_mode<synchronous>, transform_indices = @transform_2, window_bounds = array<i64: 1, 512>}, {pipeline_mode = #tpu.pipeline_mode<synchronous>, transform_indices = @transform_3, window_bounds = array<i64: 512, 256>}, {pipeline_mode = #tpu.pipeline_mode<synchronous>, transform_indices = @transform_4, window_bounds = array<i64: 1, 256>}, {pipeline_mode = #tpu.pipeline_mode<synchronous>, transform_indices = @transform_5, window_bounds = array<i64: 256, 128>}, {pipeline_mode = #tpu.pipeline_mode<synchronous>, transform_indices = @transform_6, window_bounds = array<i64: 1, 128>}, {pipeline_mode = #tpu.pipeline_mode<synchronous>, transform_indices = @transform_7, window_bounds = array<i64: 128, 128>}, {pipeline_mode = #tpu.pipeline_mode<synchronous>, transform_indices = @transform_8, window_bounds = array<i64: 1, 128>}, {transform_indices = @transform_9, window_bounds = array<i64: 8, 128>}]} {
    %c0_i32 = arith.constant 0 : i32
    %0 = arith.cmpi eq, %arg1, %c0_i32 : i32
    %1 = arith.extui %0 : i1 to i32
    %c0_i32_0 = arith.constant 0 : i32
    %2 = arith.cmpi ne, %1, %c0_i32_0 : i32
    scf.if %2 {
      %c0_10 = arith.constant 0 : index
      %c0_11 = arith.constant 0 : index
      %12 = vector.load %arg4[%c0_10, %c0_11] : memref<1x512xf32, #tpu.memory_space<vmem>>, vector<1x512xf32>
      %13 = vector.shape_cast %12 : vector<1x512xf32> to vector<1x512xf32>
      %14 = vector.broadcast %13 : vector<1x512xf32> to vector<8x512xf32>
      %c0_12 = arith.constant 0 : index
      %c0_13 = arith.constant 0 : index
      %15 = vector.load %arg12[%c0_12, %c0_13] : memref<8x512xf32, #tpu.memory_space<vmem>>, vector<8x512xf32>
      tpu.vector_store %arg12[%c0_12, %c0_13], %14 {strides = array<i32>} : memref<8x512xf32, #tpu.memory_space<vmem>>, vector<8x512xf32>,
    } else {
    }
    %c0 = arith.constant 0 : index
    %c0_1 = arith.constant 0 : index
    %3 = vector.load %arg12[%c0, %c0_1] : memref<8x512xf32, #tpu.memory_space<vmem>>, vector<8x512xf32>
    %c0_2 = arith.constant 0 : index
    %c0_3 = arith.constant 0 : index
    %4 = vector.load %arg2[%c0_2, %c0_3] : memref<8x1024xbf16, #tpu.memory_space<vmem>>, vector<8x1024xbf16>
    %c0_4 = arith.constant 0 : index
    %c0_5 = arith.constant 0 : index
    %5 = vector.load %arg3[%c0_4, %c0_5] : memref<1024x512xbf16, #tpu.memory_space<vmem>>, vector<1024x512xbf16>
    %cst = arith.constant dense<0.000000e+00> : vector<8x512xf32>
    %6 = tpu.matmul %4, %5, %cst {dimension_numbers = #tpu.dot_dimension_numbers<[1], [0], [0], [1], [0, 0, 1, 1], [], []>} : vector<8x1024xbf16>, vector<1024x512xbf16>, vector<8x512xf32> -> vector<8x512xf32>
    %7 = arith.addf %3, %6 : vector<8x512xf32>
    %c0_6 = arith.constant 0 : index
    %c0_7 = arith.constant 0 : index
    %8 = vector.load %arg12[%c0_6, %c0_7] : memref<8x512xf32, #tpu.memory_space<vmem>>, vector<8x512xf32>
    tpu.vector_store %arg12[%c0_6, %c0_7], %7 {strides = array<i32>} : memref<8x512xf32, #tpu.memory_space<vmem>>, vector<8x512xf32>,
    %c0_i32_8 = arith.constant 0 : i32
    %9 = arith.cmpi eq, %arg1, %c0_i32_8 : i32
    %10 = arith.extui %9 : i1 to i32
    %c0_i32_9 = arith.constant 0 : i32
    %11 = arith.cmpi ne, %10, %c0_i32_9 : i32
    scf.if %11 {
      %c0_10 = arith.constant 0 : index
      %c0_11 = arith.constant 0 : index
      %12 = vector.load %arg12[%c0_10, %c0_11] : memref<8x512xf32, #tpu.memory_space<vmem>>, vector<8x512xf32>
      %cst_12 = arith.constant 0.000000e+00 : f32
      %13 = vector.broadcast %cst_12 : f32 to vector<8x512xf32>
      %14 = arith.cmpf ogt, %12, %13 : vector<8x512xf32>
      %cst_13 = arith.constant 2.000000e-01 : f32
      %15 = vector.broadcast %cst_13 : f32 to vector<8x512xf32>
      %16 = arith.mulf %15, %12 : vector<8x512xf32>
      %17 = arith.select %14, %12, %16 : vector<8x512xi1>, vector<8x512xf32>
      %18 = arith.truncf %17 : vector<8x512xf32> to vector<8x512xbf16>
      %c0_14 = arith.constant 0 : index
      %c0_15 = arith.constant 0 : index
      %19 = vector.load %arg5[%c0_14, %c0_15] : memref<512x256xbf16, #tpu.memory_space<vmem>>, vector<512x256xbf16>
      %cst_16 = arith.constant dense<0.000000e+00> : vector<8x256xf32>
      %20 = tpu.matmul %18, %19, %cst_16 {dimension_numbers = #tpu.dot_dimension_numbers<[1], [0], [0], [1], [0, 0, 1, 1], [], []>} : vector<8x512xbf16>, vector<512x256xbf16>, vector<8x256xf32> -> vector<8x256xf32>
      %c0_17 = arith.constant 0 : index
      %c0_18 = arith.constant 0 : index
      %21 = vector.load %arg6[%c0_17, %c0_18] : memref<1x256xf32, #tpu.memory_space<vmem>>, vector<1x256xf32>
      %22 = vector.broadcast %21 : vector<1x256xf32> to vector<8x256xf32>
      %23 = arith.addf %20, %22 : vector<8x256xf32>
      %cst_19 = arith.constant 0.000000e+00 : f32
      %24 = vector.broadcast %cst_19 : f32 to vector<8x256xf32>
      %25 = arith.cmpf ogt, %23, %24 : vector<8x256xf32>
      %cst_20 = arith.constant 2.000000e-01 : f32
      %26 = vector.broadcast %cst_20 : f32 to vector<8x256xf32>
      %27 = arith.mulf %26, %23 : vector<8x256xf32>
      %28 = arith.select %25, %23, %27 : vector<8x256xi1>, vector<8x256xf32>
      %29 = arith.truncf %28 : vector<8x256xf32> to vector<8x256xbf16>
      %c0_21 = arith.constant 0 : index
      %c0_22 = arith.constant 0 : index
      %30 = vector.load %arg7[%c0_21, %c0_22] : memref<256x128xbf16, #tpu.memory_space<vmem>>, vector<256x128xbf16>
      %cst_23 = arith.constant dense<0.000000e+00> : vector<8x128xf32>
      %31 = tpu.matmul %29, %30, %cst_23 {dimension_numbers = #tpu.dot_dimension_numbers<[1], [0], [0], [1], [0, 0, 1, 1], [], []>} : vector<8x256xbf16>, vector<256x128xbf16>, vector<8x128xf32> -> vector<8x128xf32>
      %c0_24 = arith.constant 0 : index
      %c0_25 = arith.constant 0 : index
      %32 = vector.load %arg8[%c0_24, %c0_25] : memref<1x128xf32, #tpu.memory_space<vmem>>, vector<1x128xf32>
      %33 = vector.broadcast %32 : vector<1x128xf32> to vector<8x128xf32>
      %34 = arith.addf %31, %33 : vector<8x128xf32>
      %cst_26 = arith.constant 0.000000e+00 : f32
      %35 = vector.broadcast %cst_26 : f32 to vector<8x128xf32>
      %36 = arith.cmpf ogt, %34, %35 : vector<8x128xf32>
      %cst_27 = arith.constant 2.000000e-01 : f32
      %37 = vector.broadcast %cst_27 : f32 to vector<8x128xf32>
      %38 = arith.mulf %37, %34 : vector<8x128xf32>
      %39 = arith.select %36, %34, %38 : vector<8x128xi1>, vector<8x128xf32>
      %40 = arith.truncf %39 : vector<8x128xf32> to vector<8x128xbf16>
      %c0_28 = arith.constant 0 : index
      %c0_29 = arith.constant 0 : index
      %41 = vector.load %arg9[%c0_28, %c0_29] : memref<128x128xbf16, #tpu.memory_space<vmem>>, vector<128x128xbf16>
      %cst_30 = arith.constant dense<0.000000e+00> : vector<8x128xf32>
      %42 = tpu.matmul %40, %41, %cst_30 {dimension_numbers = #tpu.dot_dimension_numbers<[1], [0], [0], [1], [0, 0, 1, 1], [], []>} : vector<8x128xbf16>, vector<128x128xbf16>, vector<8x128xf32> -> vector<8x128xf32>
      %c0_31 = arith.constant 0 : index
      %c0_32 = arith.constant 0 : index
      %43 = vector.load %arg10[%c0_31, %c0_32] : memref<1x128xf32, #tpu.memory_space<vmem>>, vector<1x128xf32>
      %44 = vector.broadcast %43 : vector<1x128xf32> to vector<8x128xf32>
      %45 = arith.addf %42, %44 : vector<8x128xf32>
      %cst_33 = arith.constant 0.000000e+00 : f32
      %46 = vector.broadcast %cst_33 : f32 to vector<8x128xf32>
      %47 = arith.subf %46, %45 : vector<8x128xf32>
      %48 = math.exp %47 : vector<8x128xf32>
      %cst_34 = arith.constant 1.000000e+00 : f32
      %49 = vector.broadcast %cst_34 : f32 to vector<8x128xf32>
      %50 = arith.addf %49, %48 : vector<8x128xf32>
      %51 = tpu.reciprocal %50 {approx = true} : vector<8x128xf32> -> vector<8x128xf32>
      %c0_35 = arith.constant 0 : index
      %c0_36 = arith.constant 0 : index
      %52 = vector.load %arg11[%c0_35, %c0_36] : memref<8x128xf32, #tpu.memory_space<vmem>>, vector<8x128xf32>
      tpu.vector_store %arg11[%c0_35, %c0_36], %51 {strides = array<i32>} : memref<8x128xf32, #tpu.memory_space<vmem>>, vector<8x128xf32>,
    } else {
    }
    return
  }
  func.func @transform_0(%arg0: i32, %arg1: i32) -> (i32, i32) {
    %c0_i32 = arith.constant 0 : i32
    return %arg0, %arg1 : i32, i32
  }
  func.func @transform_1(%arg0: i32, %arg1: i32) -> (i32, i32) {
    %c0_i32 = arith.constant 0 : i32
    %c0_i32_0 = arith.constant 0 : i32
    return %arg1, %c0_i32 : i32, i32
  }
  func.func @transform_2(%arg0: i32, %arg1: i32) -> (i32, i32) {
    %c0_i32 = arith.constant 0 : i32
    %c0_i32_0 = arith.constant 0 : i32
    %c0_i32_1 = arith.constant 0 : i32
    return %c0_i32, %c0_i32_0 : i32, i32
  }
  func.func @transform_3(%arg0: i32, %arg1: i32) -> (i32, i32) {
    %c0_i32 = arith.constant 0 : i32
    %c0_i32_0 = arith.constant 0 : i32
    %c0_i32_1 = arith.constant 0 : i32
    return %c0_i32, %c0_i32_0 : i32, i32
  }
  func.func @transform_4(%arg0: i32, %arg1: i32) -> (i32, i32) {
    %c0_i32 = arith.constant 0 : i32
    %c0_i32_0 = arith.constant 0 : i32
    %c0_i32_1 = arith.constant 0 : i32
    return %c0_i32, %c0_i32_0 : i32, i32
  }
  func.func @transform_5(%arg0: i32, %arg1: i32) -> (i32, i32) {
    %c0_i32 = arith.constant 0 : i32
    %c0_i32_0 = arith.constant 0 : i32
    %c0_i32_1 = arith.constant 0 : i32
    return %c0_i32, %c0_i32_0 : i32, i32
  }
  func.func @transform_6(%arg0: i32, %arg1: i32) -> (i32, i32) {
    %c0_i32 = arith.constant 0 : i32
    %c0_i32_0 = arith.constant 0 : i32
    %c0_i32_1 = arith.constant 0 : i32
    return %c0_i32, %c0_i32_0 : i32, i32
  }
  func.func @transform_7(%arg0: i32, %arg1: i32) -> (i32, i32) {
    %c0_i32 = arith.constant 0 : i32
    %c0_i32_0 = arith.constant 0 : i32
    %c0_i32_1 = arith.constant 0 : i32
    return %c0_i32, %c0_i32_0 : i32, i32
  }
  func.func @transform_8(%arg0: i32, %arg1: i32) -> (i32, i32) {
    %c0_i32 = arith.constant 0 : i32
    %c0_i32_0 = arith.constant 0 : i32
    %c0_i32_1 = arith.constant 0 : i32
    return %c0_i32, %c0_i32_0 : i32, i32
  }
  func.func @transform_9(%arg0: i32, %arg1: i32) -> (i32, i32) {
    %c0_i32 = arith.constant 0 : i32
    %c0_i32_0 = arith.constant 0 : i32
    return %arg0, %c0_i32 : i32, i32
  }
}

</mosaic_0001>

<bundles_post_ra>
// kernel: tpu_custom_call.1
= control target key start
LH: loop header
LB: loop body
LE: loop exit
PB: predicated region body
PF: predicated region fallthrough
CT: control target
= control target key end

     0   :  { %14 = vsyncpa [#allocation4], 0  ;;  %s4127_s0 = inlined_call_operand.hbm [shape: bf16[8,1024], index: 0, kind: input, shape index: {}]   ;;  %s4128_s1 = inlined_call_operand.hbm [shape: bf16[1024,512], index: 1, kind: input, shape index: {}]   ;;  %s4129_s2 = inlined_call_operand.hbm [shape: f32[1,512], index: 2, kind: input, shape index: {}]   ;;  %s4130_s3 = inlined_call_operand.hbm [shape: bf16[512,256], index: 3, kind: input, shape index: {}]   ;;  %s4131_s4 = inlined_call_operand.vmem [shape: f32[1,256], index: 4, kind: input, shape index: {}]   ;;  %s4132_s5 = inlined_call_operand.hbm [shape: bf16[256,128], index: 5, kind: input, shape index: {}]   ;;  %s4133_s6 = inlined_call_operand.vmem [shape: f32[1,128], index: 6, kind: input, shape index: {}]   ;;  %s4134_s7 = inlined_call_operand.hbm [shape: bf16[128,128], index: 7, kind: input, shape index: {}]   ;;  %s4135_s8 = inlined_call_operand.vmem [shape: f32[1,128], index: 8, kind: input, shape index: {}]   ;;  %s4136_s9 = inlined_call_operand.hbm [shape: f32[8,128], index: 9, kind: output, shape index: {}]  }
   0x1   :  { %15 = vsyncpa [#allocation7], 0 }
   0x2   :  { %16 = vsyncpa [#allocation10], 0 }
   0x3   :  { %17 = vsyncpa [#allocation13], 0 }
   0x4   :  { %18 = vsyncpa [#allocation5], 0  ;;  %s3959_s30 = smov [#allocation6]  }
   0x5   :  { %s34_s10 = sshll.u32 %s3959_s30, 4  ;;  %s35_s10 = int_to_ptr.vmem [resolvable:$true] %s34_s10 }
   0x6   :  { %s3817_s11 = scalar_lea.vmem %s35_s10, 32768  ;;  %p3822_p1 = scmp.lt.s32.totalorder %s35_s10, %s35_s10 }
   0x7   :  { %p3818_p0 = scmp.ne.s32.totalorder %s35_s10, %s3817_s11  ;;  %p3823_p2 = scmp.lt.s32.totalorder %s3817_s11, %s3817_s11 }
   0x9   :  { %p3824_p3 = por %p3823_p2, %p3822_p1 }
   0xb   :  { %p3825_p4 = pnand %p3824_p3, %p3818_p0 }
   0xd   :  { %3828 = shalt.err (!%p3825_p4)
}
   0xe   :  { %s3960_s12 = smov 256   ;;  %s3961_s13 = smov 16  }
   0xf   :  { %40 = dma.hbm_to_vmem [thread:$0]  %s4128_s1, 32768, %s35_s10, [#allocation7], %s3960_s12, %s3960_s12, %s3961_s13  }
  0x10   :  { %s3962_s16 = smov [#allocation9]  }
  0x11   :  { %s56_s17 = sshll.u32 %s3962_s16, 4  ;;  %s57_s17 = int_to_ptr.vmem [resolvable:$true] %s56_s17 }
  0x12   :  { %s3837_s18 = scalar_lea.vmem %s57_s17, 8192  ;;  %p3842_p6 = scmp.lt.s32.totalorder %s57_s17, %s57_s17 }
  0x13   :  { %p3838_p5 = scmp.ne.s32.totalorder %s57_s17, %s3837_s18  ;;  %p3843_p7 = scmp.lt.s32.totalorder %s3837_s18, %s3837_s18 }
  0x15   :  { %p3844_p8 = por %p3843_p7, %p3842_p6 }
  0x17   :  { %p3845_p9 = pnand %p3844_p8, %p3838_p5 }
  0x19   :  { %3848 = shalt.err (!%p3845_p9)
}
  0x1a   :  { %s3963_s19 = smov 128   ;;  %s3964_s20 = smov 8  }
  0x1b   :  { %62 = dma.hbm_to_vmem [thread:$0]  %s4130_s3, 8192, %s57_s17, [#allocation10], %s3963_s19, %s3963_s19, %s3964_s20  }
  0x1c   :  { %s3965_s23 = smov [#allocation3]   ;;  %s3966_s25 = smov [#allocation8]  }
  0x1d   :  { %s25_s24 = sshll.u32 %s3965_s23, 4  ;;  %s47_s1 = sshll.u32 %s3966_s25, 4  ;;  %s26_s24 = int_to_ptr.vmem [resolvable:$true] %s25_s24  ;;  %s48_s1 = int_to_ptr.vmem [resolvable:$true] %s47_s1 }
  0x1e   :  { %s3857_s26 = scalar_lea.vmem %s26_s24, 512  ;;  %p3862_p11 = scmp.lt.s32.totalorder %s26_s24, %s26_s24 }
  0x1f   :  { %p3858_p10 = scmp.ne.s32.totalorder %s26_s24, %s3857_s26  ;;  %p3863_p12 = scmp.lt.s32.totalorder %s3857_s26, %s3857_s26 }
  0x21   :  { %p3864_p13 = por %p3863_p12, %p3862_p11 }
  0x23   :  { %p3865_p0 = pnand %p3864_p13, %p3858_p10 }
  0x25   :  { %3868 = shalt.err (!%p3865_p0)
}
  0x26   :  { %28 = dma.hbm_to_vmem [thread:$0]  %s4127_s0, 512, %s26_s24, [#allocation4]  }
  0x27   :  { %s3877_s29 = scalar_lea.vmem %s48_s1, 64  ;;  %p3882_p2 = scmp.lt.s32.totalorder %s48_s1, %s48_s1 }
  0x28   :  { %p3878_p1 = scmp.ne.s32.totalorder %s48_s1, %s3877_s29  ;;  %p3883_p3 = scmp.lt.s32.totalorder %s3877_s29, %s3877_s29 }
  0x2a   :  { %p3884_p4 = por %p3883_p3, %p3882_p2 }
  0x2c   :  { %p3885_p5 = pnand %p3884_p4, %p3878_p1 }
  0x2e   :  { %3888 = shalt.err (!%p3885_p5)
}
  0x2f   :  { %50 = dma.hbm_to_vmem [thread:$0]  %s4129_s2, 64, %s48_s1, [#allocation7]  }
  0x30   :  { %s3967_s10 = smov [#allocation11]  }
  0x31   :  { %s70_s11 = sshll.u32 %s3967_s10, 4  ;;  %s71_s11 = int_to_ptr.vmem [resolvable:$true] %s70_s11 }
  0x32   :  { %s3897_s12 = scalar_lea.vmem %s71_s11, 2048  ;;  %p3902_p7 = scmp.lt.s32.totalorder %s71_s11, %s71_s11 }
  0x33   :  { %p3898_p6 = scmp.ne.s32.totalorder %s71_s11, %s3897_s12  ;;  %p3903_p8 = scmp.lt.s32.totalorder %s3897_s12, %s3897_s12 }
  0x35   :  { %p3904_p9 = por %p3903_p8, %p3902_p7 }
  0x37   :  { %p3905_p10 = pnand %p3904_p9, %p3898_p6 }
  0x39   :  { %3908 = shalt.err (!%p3905_p10)
}
  0x3a   :  { %s3968_s0 = smov 64   ;;  %s3969_s13 = smov 4  }
  0x3b   :  { %76 = dma.hbm_to_vmem [thread:$0]  %s4132_s5, 2048, %s71_s11, [#allocation10], %s3968_s0, %s3968_s0, %s3969_s13  }
  0x3c   :  { %s3970_s16 = smov [#allocation12]  }
  0x3d   :  { %s84_s17 = sshll.u32 %s3970_s16, 4  ;;  %s85_s17 = int_to_ptr.vmem [resolvable:$true] %s84_s17 }
  0x3e   :  { %s3917_s2 = scalar_lea.vmem %s85_s17, 1024  ;;  %p3922_p12 = scmp.lt.s32.totalorder %s85_s17, %s85_s17 }
  0x3f   :  { %p3918_p11 = scmp.ne.s32.totalorder %s85_s17, %s3917_s2  ;;  %p3923_p13 = scmp.lt.s32.totalorder %s3917_s2, %s3917_s2 }
  0x41   :  { %p3924_p0 = por %p3923_p13, %p3922_p12 }
  0x43   :  { %p3925_p1 = pnand %p3924_p0, %p3918_p11 }
  0x45   :  { %3928 = shalt.err (!%p3925_p1)
}
  0x46   :  { %90 = dma.hbm_to_vmem [thread:$0]  %s4134_s7, 1024, %s85_s17, [#allocation13], %s3968_s0, %s3968_s0, %s3969_s13  }
  0x47   :  { %3949 = dma.done.wait [#allocation4], 512  }
  0x48   :  { %3950 = vsyncadd [#allocation4], 4294966784 }
  0x49   :  { %3951 = dma.done.wait [#allocation7], 32832  }
  0x4a   :  { %3952 = vsyncadd [#allocation7], 4294934464 }
  0x4b   :  { %3953 = dma.done.wait [#allocation10], 10240  }
  0x4c   :  { %3954 = vsyncadd [#allocation10], 4294957056 }
  0x4d   :  { %3955 = dma.done.wait [#allocation13], 1024  }
  0x4e   :  { %3956 = vsyncadd [#allocation13], 4294966272  ;;  %v3293_v0 = vld [vmem:[#allocation6 + $0xe4] ss:$16 sps:$4 sm:$0xff]   ;;  %v3297_v2 = vld [vmem:[#allocation6 + $0xe0] ss:$16 sps:$4 sm:$0xff]  }
  0x4f   :  { %v3295_v1 = vld [vmem:[#allocation6 + $0x2e4] ss:$16 sps:$4 sm:$0xff]   ;;  %1714 = vmatprep.subr.bf16.mxu0 %v3293_v0  ;;  %v3298_v3 = vld [vmem:[#allocation6 + $0x2e0] ss:$16 sps:$4 sm:$0xff]   ;;  %v147_v48 = vld [vmem:[#allocation3 + $0x8] sm:$0xff]  ;;  %vm3972_vm6 = vmmov 0  }
  0x50   :  { %1755 = vmatprep.subr.bf16.mxu1 %v3295_v1  ;;  %v3299_v4 = vld [vmem:[#allocation6 + $0xc4] ss:$16 sps:$4 sm:$0xff]   ;;  %1715 = vmatpush1.bf16.msra.mxu0 %v3297_v2  ;;  %v3303_v6 = vld [vmem:[#allocation6 + $0xc0] ss:$16 sps:$4 sm:$0xff]   ;;  %v4044_v51 = vcombine.high %v147_v48, %v147_v48 }
  0x51   :  { %1756 = vmatpush1.bf16.msra.mxu1 %v3298_v3  ;;  %v3301_v5 = vld [vmem:[#allocation6 + $0x2c4] ss:$16 sps:$4 sm:$0xff]   ;;  %1716 = vmatprep.subr.bf16.mxu0 %v3299_v4  ;;  %v3304_v7 = vld [vmem:[#allocation6 + $0x2c0] ss:$16 sps:$4 sm:$0xff]  }
  0x52   :  { %1757 = vmatprep.subr.bf16.mxu1 %v3301_v5  ;;  %v3305_v8 = vld [vmem:[#allocation6 + $0xa4] ss:$16 sps:$4 sm:$0xff]   ;;  %v3309_v10 = vld [vmem:[#allocation6 + $0xa0] ss:$16 sps:$4 sm:$0xff]   ;;  %1787 = vmatprep.mubr.bf16.mxu1 %v4044_v51 }
  0x53   :  { %v3307_v9 = vld [vmem:[#allocation6 + $0x2a4] ss:$16 sps:$4 sm:$0xff]   ;;  %v3310_v11 = vld [vmem:[#allocation6 + $0x2a0] ss:$16 sps:$4 sm:$0xff]  }
  0x54   :  { %1717 = vmatpush1.bf16.msra.mxu0 %v3303_v6  ;;  %v3311_v12 = vld [vmem:[#allocation6 + $0x84] ss:$16 sps:$4 sm:$0xff]   ;;  %v3315_v14 = vld [vmem:[#allocation6 + $0x80] ss:$16 sps:$4 sm:$0xff]  }
  0x55   :  { %1758 = vmatpush1.bf16.msra.mxu1 %v3304_v7  ;;  %1718 = vmatprep.subr.bf16.mxu0 %v3305_v8  ;;  %v3313_v13 = vld [vmem:[#allocation6 + $0x284] ss:$16 sps:$4 sm:$0xff]   ;;  %v3316_v15 = vld [vmem:[#allocation6 + $0x280] ss:$16 sps:$4 sm:$0xff]   ;;  %v4050_v7 = vcombine.low %v147_v48, %v147_v48 }
  0x56   :  { %1759 = vmatprep.subr.bf16.mxu1 %v3307_v9  ;;  %v3317_v16 = vld [vmem:[#allocation6 + $0x64] ss:$16 sps:$4 sm:$0xff]   ;;  %v3321_v18 = vld [vmem:[#allocation6 + $0x60] ss:$16 sps:$4 sm:$0xff]  }
  0x57   :  { %v3319_v17 = vld [vmem:[#allocation6 + $0x264] ss:$16 sps:$4 sm:$0xff]   ;;  %v3322_v19 = vld [vmem:[#allocation6 + $0x260] ss:$16 sps:$4 sm:$0xff]  }
  0x58   :  { %1719 = vmatpush1.bf16.msra.mxu0 %v3309_v10  ;;  %v3323_v20 = vld [vmem:[#allocation6 + $0x44] ss:$16 sps:$4 sm:$0xff]   ;;  %v3327_v22 = vld [vmem:[#allocation6 + $0x40] ss:$16 sps:$4 sm:$0xff]  }
  0x59   :  { %1760 = vmatpush1.bf16.msra.mxu1 %v3310_v11  ;;  %1720 = vmatprep.subr.bf16.mxu0 %v3311_v12  ;;  %v3325_v21 = vld [vmem:[#allocation6 + $0x244] ss:$16 sps:$4 sm:$0xff]   ;;  %v3328_v23 = vld [vmem:[#allocation6 + $0x240] ss:$16 sps:$4 sm:$0xff]  }
  0x5a   :  { %1761 = vmatprep.subr.bf16.mxu1 %v3313_v13  ;;  %v3329_v24 = vld [vmem:[#allocation6 + $0x24] ss:$16 sps:$4 sm:$0xff]   ;;  %v3333_v26 = vld [vmem:[#allocation6 + $0x20] ss:$16 sps:$4 sm:$0xff]  }
  0x5b   :  { %v3331_v25 = vld [vmem:[#allocation6 + $0x224] ss:$16 sps:$4 sm:$0xff]   ;;  %v3334_v27 = vld [vmem:[#allocation6 + $0x220] ss:$16 sps:$4 sm:$0xff]  }
  0x5c   :  { %1721 = vmatpush1.bf16.msra.mxu0 %v3315_v14  ;;  %v3335_v28 = vld [vmem:[#allocation6 + $0x4] ss:$16 sps:$4 sm:$0xff]   ;;  %v3339_v30 = vld [vmem:[#allocation6] ss:$16 sps:$4 sm:$0xff]  }
  0x5d   :  { %1762 = vmatpush1.bf16.msra.mxu1 %v3316_v15  ;;  %1722 = vmatprep.subr.bf16.mxu0 %v3317_v16  ;;  %v3337_v29 = vld [vmem:[#allocation6 + $0x204] ss:$16 sps:$4 sm:$0xff]   ;;  %v3340_v31 = vld [vmem:[#allocation6 + $0x200] ss:$16 sps:$4 sm:$0xff]  }
  0x5e   :  { %1763 = vmatprep.subr.bf16.mxu1 %v3319_v17  ;;  %v3341_v32 = vld [vmem:[#allocation6 + $0x1e4] ss:$16 sps:$4 sm:$0xff]   ;;  %v3345_v34 = vld [vmem:[#allocation6 + $0x1e0] ss:$16 sps:$4 sm:$0xff]  }
  0x5f   :  { %v3343_v33 = vld [vmem:[#allocation6 + $0x3e4] ss:$16 sps:$4 sm:$0xff]   ;;  %v3346_v35 = vld [vmem:[#allocation6 + $0x3e0] ss:$16 sps:$4 sm:$0xff]  }
  0x60   :  { %1723 = vmatpush1.bf16.msra.mxu0 %v3321_v18  ;;  %v3347_v36 = vld [vmem:[#allocation6 + $0x1c4] ss:$16 sps:$4 sm:$0xff]   ;;  %v3351_v38 = vld [vmem:[#allocation6 + $0x1c0] ss:$16 sps:$4 sm:$0xff]  }
  0x61   :  { %1764 = vmatpush1.bf16.msra.mxu1 %v3322_v19  ;;  %1724 = vmatprep.subr.bf16.mxu0 %v3323_v20  ;;  %v3349_v37 = vld [vmem:[#allocation6 + $0x3c4] ss:$16 sps:$4 sm:$0xff]   ;;  %v3352_v39 = vld [vmem:[#allocation6 + $0x3c0] ss:$16 sps:$4 sm:$0xff]  }
  0x62   :  { %1765 = vmatprep.subr.bf16.mxu1 %v3325_v21  ;;  %v3353_v40 = vld [vmem:[#allocation6 + $0x1a4] ss:$16 sps:$4 sm:$0xff]   ;;  %v3357_v42 = vld [vmem:[#allocation6 + $0x1a0] ss:$16 sps:$4 sm:$0xff]  }
  0x63   :  { %v3355_v41 = vld [vmem:[#allocation6 + $0x3a4] ss:$16 sps:$4 sm:$0xff]   ;;  %v3358_v43 = vld [vmem:[#allocation6 + $0x3a0] ss:$16 sps:$4 sm:$0xff]  }
  0x64   :  { %1725 = vmatpush1.bf16.msra.mxu0 %v3327_v22  ;;  %v3359_v44 = vld [vmem:[#allocation6 + $0x184] ss:$16 sps:$4 sm:$0xff]   ;;  %v3363_v49 = vld [vmem:[#allocation6 + $0x180] ss:$16 sps:$4 sm:$0xff]  }
  0x65   :  { %1766 = vmatpush1.bf16.msra.mxu1 %v3328_v23  ;;  %1726 = vmatprep.subr.bf16.mxu0 %v3329_v24  ;;  %v3361_v45 = vld [vmem:[#allocation6 + $0x384] ss:$16 sps:$4 sm:$0xff]   ;;  %v3364_v50 = vld [vmem:[#allocation6 + $0x380] ss:$16 sps:$4 sm:$0xff]  }
  0x66   :  { %1767 = vmatprep.subr.bf16.mxu1 %v3331_v25  ;;  %v146_v46 = vld [vmem:[#allocation3] sm:$0xff] }
  0x67   :  { %v4042_v47 = vcombine.high %v146_v46, %v146_v46  ;;  %v3365_v52 = vld [vmem:[#allocation6 + $0x164] ss:$16 sps:$4 sm:$0xff]   ;;  %v3369_v54 = vld [vmem:[#allocation6 + $0x160] ss:$16 sps:$4 sm:$0xff]   ;;  %v4048_v6 = vcombine.low %v146_v46, %v146_v46 }
  0x68   :  { %1727 = vmatpush1.bf16.msra.mxu0 %v3333_v26  ;;  %v3367_v53 = vld [vmem:[#allocation6 + $0x364] ss:$16 sps:$4 sm:$0xff]   ;;  %v3370_v55 = vld [vmem:[#allocation6 + $0x360] ss:$16 sps:$4 sm:$0xff]  }
  0x69   :  { %1768 = vmatpush1.bf16.msra.mxu1 %v3334_v27  ;;  %1728 = vmatprep.subr.bf16.mxu0 %v3335_v28  ;;  %v3371_v56 = vld [vmem:[#allocation6 + $0x144] ss:$16 sps:$4 sm:$0xff]   ;;  %v3375_v58 = vld [vmem:[#allocation6 + $0x140] ss:$16 sps:$4 sm:$0xff]  }
  0x6a   :  { %1769 = vmatprep.subr.bf16.mxu1 %v3337_v29  ;;  %1746 = vmatprep.mubr.bf16.mxu0 %v4042_v47  ;;  %v3373_v57 = vld [vmem:[#allocation6 + $0x344] ss:$16 sps:$4 sm:$0xff]   ;;  %v3376_v59 = vld [vmem:[#allocation6 + $0x340] ss:$16 sps:$4 sm:$0xff]  }
  0x6b   :  { %v3377_v60 = vld [vmem:[#allocation6 + $0x124] ss:$16 sps:$4 sm:$0xff]   ;;  %v3381_v62 = vld [vmem:[#allocation6 + $0x120] ss:$16 sps:$4 sm:$0xff]  }
  0x6c   :  { %1729 = vmatpush1.bf16.msra.mxu0 %v3339_v30  ;;  %v3379_v61 = vld [vmem:[#allocation6 + $0x324] ss:$16 sps:$4 sm:$0xff]   ;;  %v3382_v63 = vld [vmem:[#allocation6 + $0x320] ss:$16 sps:$4 sm:$0xff]  }
  0x6d   :  { %1770 = vmatpush1.bf16.msra.mxu1 %v3340_v31  ;;  %1730 = vmatprep.subr.bf16.mxu0 %v3341_v32  ;;  %v3383_v0 = vld [vmem:[#allocation6 + $0x104] ss:$16 sps:$4 sm:$0xff]   ;;  %v3387_v2 = vld [vmem:[#allocation6 + $0x100] ss:$16 sps:$4 sm:$0xff]  }
  0x6e   :  { %1771 = vmatprep.subr.bf16.mxu1 %v3343_v33  ;;  %v3385_v1 = vld [vmem:[#allocation6 + $0x304] ss:$16 sps:$4 sm:$0xff]   ;;  %v3388_v3 = vld [vmem:[#allocation6 + $0x300] ss:$16 sps:$4 sm:$0xff]   ;;  %v4056_v33 = vld [vmem:[#allocation3 + $0x18] sm:$0xff] }
  0x6f   :  { %v3395_v4 = vld [vmem:[#allocation6 + $0x4e4] ss:$16 sps:$4 sm:$0xff]   ;;  %v3393_v8 = vld [vmem:[#allocation6 + $0x4e0] ss:$16 sps:$4 sm:$0xff]  }
  0x70   :  { %1731 = vmatpush2.bf16.msra.mxu0 %v3345_v34  ;;  %v3398_v5 = vld [vmem:[#allocation6 + $0x6e4] ss:$16 sps:$4 sm:$0xff]   ;;  %v3396_v9 = vld [vmem:[#allocation6 + $0x6e0] ss:$16 sps:$4 sm:$0xff]  }
  0x71   :  { %1772 = vmatpush2.bf16.msra.mxu1 %v3346_v35  ;;  %1732 = vmatprep.subr.bf16.mxu0 %v3347_v36  ;;  %v3401_v10 = vld [vmem:[#allocation6 + $0x4c4] ss:$16 sps:$4 sm:$0xff]   ;;  %v3399_v12 = vld [vmem:[#allocation6 + $0x4c0] ss:$16 sps:$4 sm:$0xff]  }
  0x72   :  { %1773 = vmatprep.subr.bf16.mxu1 %v3349_v37  ;;  %v3404_v11 = vld [vmem:[#allocation6 + $0x6c4] ss:$16 sps:$4 sm:$0xff]   ;;  %v3402_v13 = vld [vmem:[#allocation6 + $0x6c0] ss:$16 sps:$4 sm:$0xff]   ;;  %v4064_v37 = vcombine.high %v4056_v33, %v4056_v33 }
  0x73   :  { %v3407_v14 = vld [vmem:[#allocation6 + $0x4a4] ss:$16 sps:$4 sm:$0xff]   ;;  %v3405_v16 = vld [vmem:[#allocation6 + $0x4a0] ss:$16 sps:$4 sm:$0xff]  }
  0x74   :  { %1733 = vmatpush2.bf16.msra.mxu0 %v3351_v38  ;;  %v3410_v15 = vld [vmem:[#allocation6 + $0x6a4] ss:$16 sps:$4 sm:$0xff]   ;;  %v3408_v17 = vld [vmem:[#allocation6 + $0x6a0] ss:$16 sps:$4 sm:$0xff]  }
  0x75   :  { %1774 = vmatpush2.bf16.msra.mxu1 %v3352_v39  ;;  %1734 = vmatprep.subr.bf16.mxu0 %v3353_v40  ;;  %v3413_v18 = vld [vmem:[#allocation6 + $0x484] ss:$16 sps:$4 sm:$0xff]   ;;  %v3411_v20 = vld [vmem:[#allocation6 + $0x480] ss:$16 sps:$4 sm:$0xff]  }
  0x76   :  { %1775 = vmatprep.subr.bf16.mxu1 %v3355_v41  ;;  %v3416_v19 = vld [vmem:[#allocation6 + $0x684] ss:$16 sps:$4 sm:$0xff]   ;;  %v3414_v21 = vld [vmem:[#allocation6 + $0x680] ss:$16 sps:$4 sm:$0xff]  }
  0x77   :  { %v3419_v22 = vld [vmem:[#allocation6 + $0x464] ss:$16 sps:$4 sm:$0xff]   ;;  %v3417_v24 = vld [vmem:[#allocation6 + $0x460] ss:$16 sps:$4 sm:$0xff]  }
  0x78   :  { %1735 = vmatpush2.bf16.msra.mxu0 %v3357_v42  ;;  %v3422_v23 = vld [vmem:[#allocation6 + $0x664] ss:$16 sps:$4 sm:$0xff]   ;;  %v3420_v25 = vld [vmem:[#allocation6 + $0x660] ss:$16 sps:$4 sm:$0xff]  }
  0x79   :  { %1776 = vmatpush2.bf16.msra.mxu1 %v3358_v43  ;;  %1736 = vmatprep.subr.bf16.mxu0 %v3359_v44  ;;  %v3425_v26 = vld [vmem:[#allocation6 + $0x444] ss:$16 sps:$4 sm:$0xff]   ;;  %v3423_v28 = vld [vmem:[#allocation6 + $0x440] ss:$16 sps:$4 sm:$0xff]  }
  0x7a   :  { %1777 = vmatprep.subr.bf16.mxu1 %v3361_v45  ;;  %v3428_v27 = vld [vmem:[#allocation6 + $0x644] ss:$16 sps:$4 sm:$0xff]   ;;  %v3426_v29 = vld [vmem:[#allocation6 + $0x640] ss:$16 sps:$4 sm:$0xff]  }
  0x7b   :  { %v3431_v30 = vld [vmem:[#allocation6 + $0x424] ss:$16 sps:$4 sm:$0xff]   ;;  %v3429_v34 = vld [vmem:[#allocation6 + $0x420] ss:$16 sps:$4 sm:$0xff]  }
  0x7c   :  { %1737 = vmatpush2.bf16.msra.mxu0 %v3363_v49  ;;  %v3434_v31 = vld [vmem:[#allocation6 + $0x624] ss:$16 sps:$4 sm:$0xff]   ;;  %v3432_v35 = vld [vmem:[#allocation6 + $0x620] ss:$16 sps:$4 sm:$0xff]  }
  0x7d   :  { %1778 = vmatpush2.bf16.msra.mxu1 %v3364_v50  ;;  %1738 = vmatprep.subr.bf16.mxu0 %v3365_v52  ;;  %v4054_v32 = vld [vmem:[#allocation3 + $0x10] sm:$0xff] }
  0x7e   :  { %1779 = vmatprep.subr.bf16.mxu1 %v3367_v53  ;;  %v4060_v36 = vcombine.high %v4054_v32, %v4054_v32  ;;  %v3437_v38 = vld [vmem:[#allocation6 + $0x404] ss:$16 sps:$4 sm:$0xff]   ;;  %v3435_v40 = vld [vmem:[#allocation6 + $0x400] ss:$16 sps:$4 sm:$0xff]  }
  0x7f   :  { %v3440_v39 = vld [vmem:[#allocation6 + $0x604] ss:$16 sps:$4 sm:$0xff]   ;;  %v3438_v41 = vld [vmem:[#allocation6 + $0x600] ss:$16 sps:$4 sm:$0xff]  }
  0x80   :  { %1739 = vmatpush2.bf16.msra.mxu0 %v3369_v54  ;;  %v3443_v42 = vld [vmem:[#allocation6 + $0x5e4] ss:$16 sps:$4 sm:$0xff]   ;;  %v3441_v44 = vld [vmem:[#allocation6 + $0x5e0] ss:$16 sps:$4 sm:$0xff]  }
  0x81   :  { %1780 = vmatpush2.bf16.msra.mxu1 %v3370_v55  ;;  %1740 = vmatprep.subr.bf16.mxu0 %v3371_v56  ;;  %v3446_v43 = vld [vmem:[#allocation6 + $0x7e4] ss:$16 sps:$4 sm:$0xff]   ;;  %v3444_v45 = vld [vmem:[#allocation6 + $0x7e0] ss:$16 sps:$4 sm:$0xff]  }
  0x82   :  { %1781 = vmatprep.subr.bf16.mxu1 %v3373_v57  ;;  %v3449_v46 = vld [vmem:[#allocation6 + $0x5c4] ss:$16 sps:$4 sm:$0xff]   ;;  %v3447_v49 = vld [vmem:[#allocation6 + $0x5c0] ss:$16 sps:$4 sm:$0xff]  }
  0x83   :  { %v3452_v48 = vld [vmem:[#allocation6 + $0x7c4] ss:$16 sps:$4 sm:$0xff]   ;;  %v3450_v50 = vld [vmem:[#allocation6 + $0x7c0] ss:$16 sps:$4 sm:$0xff]  }
  0x84   :  { %1741 = vmatpush2.bf16.msra.mxu0 %v3375_v58  ;;  %v3455_v52 = vld [vmem:[#allocation6 + $0x5a4] ss:$16 sps:$4 sm:$0xff]   ;;  %v3453_v54 = vld [vmem:[#allocation6 + $0x5a0] ss:$16 sps:$4 sm:$0xff]  }
  0x85   :  { %1782 = vmatpush2.bf16.msra.mxu1 %v3376_v59  ;;  %1742 = vmatprep.subr.bf16.mxu0 %v3377_v60  ;;  %v3458_v53 = vld [vmem:[#allocation6 + $0x7a4] ss:$16 sps:$4 sm:$0xff]   ;;  %v3456_v55 = vld [vmem:[#allocation6 + $0x7a0] ss:$16 sps:$4 sm:$0xff]  }
  0x86   :  { %1783 = vmatprep.subr.bf16.mxu1 %v3379_v61  ;;  %v3461_v56 = vld [vmem:[#allocation6 + $0x584] ss:$16 sps:$4 sm:$0xff]   ;;  %v3459_v58 = vld [vmem:[#allocation6 + $0x580] ss:$16 sps:$4 sm:$0xff]  }
  0x87   :  { %v3464_v57 = vld [vmem:[#allocation6 + $0x784] ss:$16 sps:$4 sm:$0xff]   ;;  %v3462_v59 = vld [vmem:[#allocation6 + $0x780] ss:$16 sps:$4 sm:$0xff]  }
  0x88   :  { %1743 = vmatpush2.bf16.msra.mxu0 %v3381_v62  ;;  %v3467_v60 = vld [vmem:[#allocation6 + $0x564] ss:$16 sps:$4 sm:$0xff]   ;;  %v3465_v62 = vld [vmem:[#allocation6 + $0x560] ss:$16 sps:$4 sm:$0xff]  }
  0x89   :  { %1784 = vmatpush2.bf16.msra.mxu1 %v3382_v63  ;;  %1744 = vmatprep.subr.bf16.mxu0 %v3383_v0  ;;  %v3470_v61 = vld [vmem:[#allocation6 + $0x764] ss:$16 sps:$4 sm:$0xff]   ;;  %v3468_v63 = vld [vmem:[#allocation6 + $0x760] ss:$16 sps:$4 sm:$0xff]  }
  0x8a   :  { %1785 = vmatprep.subr.bf16.mxu1 %v3385_v1  ;;  %v3473_v0 = vld [vmem:[#allocation6 + $0x544] ss:$16 sps:$4 sm:$0xff]  }
  0x8b   :  { %v3476_v1 = vld [vmem:[#allocation6 + $0x744] ss:$16 sps:$4 sm:$0xff]  }
  0x8c   :  { %1745 = vmatpush2.bf16.msra.mxu0 %v3387_v2  ;;  %v3471_v2 = vld [vmem:[#allocation6 + $0x540] ss:$16 sps:$4 sm:$0xff]  }
  0x8d   :  { %1786 = vmatpush2.bf16.msra.mxu1 %v3388_v3  ;;  %1796 = vmatprep.subr.bf16.mxu0 %v3395_v4  ;;  %v3474_v3 = vld [vmem:[#allocation6 + $0x740] ss:$16 sps:$4 sm:$0xff]   ;;  %v3479_v4 = vld [vmem:[#allocation6 + $0x524] ss:$16 sps:$4 sm:$0xff]  }
  0x8e   :  { %1837 = vmatprep.subr.bf16.mxu1 %v3398_v5  ;;  %v3482_v5 = vld [vmem:[#allocation6 + $0x724] ss:$16 sps:$4 sm:$0xff]  }
  0x8f   :  { %1747 = vmatmul.mubr.bf16.vlgmr.msra.gmra.mxu0 %v4048_v6 }
  0x90   :  { %1788 = vmatmul.mubr.bf16.vlgmr.msra.gmra.mxu1 %v4050_v7  ;;  %1797 = vmatpush1.bf16.msra.mxu0 %v3393_v8  ;;  %v3477_v8 = vld [vmem:[#allocation6 + $0x520] ss:$16 sps:$4 sm:$0xff]  }
  0x91   :  { %1838 = vmatpush1.bf16.msra.mxu1 %v3396_v9  ;;  %1798 = vmatprep.subr.bf16.mxu0 %v3401_v10  ;;  %v3480_v9 = vld [vmem:[#allocation6 + $0x720] ss:$16 sps:$4 sm:$0xff]   ;;  %v3485_v10 = vld [vmem:[#allocation6 + $0x504] ss:$16 sps:$4 sm:$0xff]  }
  0x92   :  { %1839 = vmatprep.subr.bf16.mxu1 %v3404_v11  ;;  %1828 = vmatprep.mubr.bf16.mxu0 %v4060_v36  ;;  %v3488_v11 = vld [vmem:[#allocation6 + $0x704] ss:$16 sps:$4 sm:$0xff]  }
  0x93   :  { %1869 = vmatprep.mubr.bf16.mxu1 %v4064_v37 }
  0x94   :  { %1799 = vmatpush1.bf16.msra.mxu0 %v3399_v12  ;;  %v3483_v12 = vld [vmem:[#allocation6 + $0x500] ss:$16 sps:$4 sm:$0xff]  }
  0x95   :  { %1840 = vmatpush1.bf16.msra.mxu1 %v3402_v13  ;;  %1800 = vmatprep.subr.bf16.mxu0 %v3407_v14  ;;  %v3486_v13 = vld [vmem:[#allocation6 + $0x700] ss:$16 sps:$4 sm:$0xff]   ;;  %v3495_v14 = vld [vmem:[#allocation6 + $0xec] ss:$16 sps:$4 sm:$0xff]  }
  0x96   :  { %1841 = vmatprep.subr.bf16.mxu1 %v3410_v15  ;;  %v3498_v15 = vld [vmem:[#allocation6 + $0x2ec] ss:$16 sps:$4 sm:$0xff]  }
  0x98   :  { %1801 = vmatpush1.bf16.msra.mxu0 %v3405_v16  ;;  %v4070_v16 = vcombine.low %v4054_v32, %v4054_v32  ;;  %v3519_v32 = vld [vmem:[#allocation6 + $0x6c] ss:$16 sps:$4 sm:$0xff]  }
  0x99   :  { %1842 = vmatpush1.bf16.msra.mxu1 %v3408_v17  ;;  %1802 = vmatprep.subr.bf16.mxu0 %v3413_v18  ;;  %v4074_v17 = vcombine.low %v4056_v33, %v4056_v33  ;;  %v3493_v18 = vld [vmem:[#allocation6 + $0xe8] ss:$16 sps:$4 sm:$0xff]   ;;  %v3522_v33 = vld [vmem:[#allocation6 + $0x26c] ss:$16 sps:$4 sm:$0xff]  }
  0x9a   :  { %1843 = vmatprep.subr.bf16.mxu1 %v3416_v19  ;;  %v3496_v19 = vld [vmem:[#allocation6 + $0x2e8] ss:$16 sps:$4 sm:$0xff]  }
  0x9c   :  { %1803 = vmatpush1.bf16.msra.mxu0 %v3411_v20  ;;  %v3501_v20 = vld [vmem:[#allocation6 + $0xcc] ss:$16 sps:$4 sm:$0xff]  }
  0x9d   :  { %1844 = vmatpush1.bf16.msra.mxu1 %v3414_v21  ;;  %1804 = vmatprep.subr.bf16.mxu0 %v3419_v22  ;;  %v3504_v21 = vld [vmem:[#allocation6 + $0x2cc] ss:$16 sps:$4 sm:$0xff]   ;;  %v3499_v22 = vld [vmem:[#allocation6 + $0xc8] ss:$16 sps:$4 sm:$0xff]  }
  0x9e   :  { %1845 = vmatprep.subr.bf16.mxu1 %v3422_v23  ;;  %v3502_v23 = vld [vmem:[#allocation6 + $0x2c8] ss:$16 sps:$4 sm:$0xff]  }
  0xa0   :  { %1805 = vmatpush1.bf16.msra.mxu0 %v3417_v24  ;;  %v3507_v24 = vld [vmem:[#allocation6 + $0xac] ss:$16 sps:$4 sm:$0xff]  }
  0xa1   :  { %1846 = vmatpush1.bf16.msra.mxu1 %v3420_v25  ;;  %1806 = vmatprep.subr.bf16.mxu0 %v3425_v26  ;;  %v3510_v25 = vld [vmem:[#allocation6 + $0x2ac] ss:$16 sps:$4 sm:$0xff]   ;;  %v3505_v26 = vld [vmem:[#allocation6 + $0xa8] ss:$16 sps:$4 sm:$0xff]  }
  0xa2   :  { %1847 = vmatprep.subr.bf16.mxu1 %v3428_v27  ;;  %v3508_v27 = vld [vmem:[#allocation6 + $0x2a8] ss:$16 sps:$4 sm:$0xff]  }
  0xa4   :  { %1807 = vmatpush1.bf16.msra.mxu0 %v3423_v28  ;;  %v3513_v28 = vld [vmem:[#allocation6 + $0x8c] ss:$16 sps:$4 sm:$0xff]  }
  0xa5   :  { %1848 = vmatpush1.bf16.msra.mxu1 %v3426_v29  ;;  %1808 = vmatprep.subr.bf16.mxu0 %v3431_v30  ;;  %v3516_v29 = vld [vmem:[#allocation6 + $0x28c] ss:$16 sps:$4 sm:$0xff]   ;;  %v3511_v30 = vld [vmem:[#allocation6 + $0x88] ss:$16 sps:$4 sm:$0xff]  }
  0xa6   :  { %1849 = vmatprep.subr.bf16.mxu1 %v3434_v31  ;;  %v3514_v31 = vld [vmem:[#allocation6 + $0x288] ss:$16 sps:$4 sm:$0xff]  }
  0xa8   :  { %1809 = vmatpush1.bf16.msra.mxu0 %v3429_v34  ;;  %v3517_v34 = vld [vmem:[#allocation6 + $0x68] ss:$16 sps:$4 sm:$0xff]  }
  0xa9   :  { %1850 = vmatpush1.bf16.msra.mxu1 %v3432_v35  ;;  %1810 = vmatprep.subr.bf16.mxu0 %v3437_v38  ;;  %v3528_v35 = vld [vmem:[#allocation6 + $0x24c] ss:$16 sps:$4 sm:$0xff]   ;;  %v3523_v38 = vld [vmem:[#allocation6 + $0x48] ss:$16 sps:$4 sm:$0xff]  }
  0xaa   :  { %1851 = vmatprep.subr.bf16.mxu1 %v3440_v39  ;;  %v3526_v39 = vld [vmem:[#allocation6 + $0x248] ss:$16 sps:$4 sm:$0xff]  }
  0xac   :  { %1811 = vmatpush1.bf16.msra.mxu0 %v3435_v40  ;;  %v3531_v40 = vld [vmem:[#allocation6 + $0x2c] ss:$16 sps:$4 sm:$0xff]  }
  0xad   :  { %1852 = vmatpush1.bf16.msra.mxu1 %v3438_v41  ;;  %1812 = vmatprep.subr.bf16.mxu0 %v3443_v42  ;;  %v3534_v41 = vld [vmem:[#allocation6 + $0x22c] ss:$16 sps:$4 sm:$0xff]   ;;  %v3529_v42 = vld [vmem:[#allocation6 + $0x28] ss:$16 sps:$4 sm:$0xff]  }
  0xae   :  { %1853 = vmatprep.subr.bf16.mxu1 %v3446_v43  ;;  %v3532_v43 = vld [vmem:[#allocation6 + $0x228] ss:$16 sps:$4 sm:$0xff]  }
  0xb0   :  { %1813 = vmatpush2.bf16.msra.mxu0 %v3441_v44  ;;  %v3537_v44 = vld [vmem:[#allocation6 + $0xc] ss:$16 sps:$4 sm:$0xff]  }
  0xb1   :  { %1854 = vmatpush2.bf16.msra.mxu1 %v3444_v45  ;;  %1814 = vmatprep.subr.bf16.mxu0 %v3449_v46  ;;  %v3540_v45 = vld [vmem:[#allocation6 + $0x20c] ss:$16 sps:$4 sm:$0xff]   ;;  %v3535_v46 = vld [vmem:[#allocation6 + $0x8] ss:$16 sps:$4 sm:$0xff]  }
  0xb2   :  { %1855 = vmatprep.subr.bf16.mxu1 %v3452_v48  ;;  %v3538_v48 = vld [vmem:[#allocation6 + $0x208] ss:$16 sps:$4 sm:$0xff]  }
  0xb4   :  { %1815 = vmatpush2.bf16.msra.mxu0 %v3447_v49  ;;  %v3543_v49 = vld [vmem:[#allocation6 + $0x1ec] ss:$16 sps:$4 sm:$0xff]  }
  0xb5   :  { %1856 = vmatpush2.bf16.msra.mxu1 %v3450_v50  ;;  %1816 = vmatprep.subr.bf16.mxu0 %v3455_v52  ;;  %v3546_v50 = vld [vmem:[#allocation6 + $0x3ec] ss:$16 sps:$4 sm:$0xff]   ;;  %v3541_v52 = vld [vmem:[#allocation6 + $0x1e8] ss:$16 sps:$4 sm:$0xff]  }
  0xb6   :  { %1857 = vmatprep.subr.bf16.mxu1 %v3458_v53  ;;  %v3544_v53 = vld [vmem:[#allocation6 + $0x3e8] ss:$16 sps:$4 sm:$0xff]  }
  0xb8   :  { %1817 = vmatpush2.bf16.msra.mxu0 %v3453_v54  ;;  %v3549_v54 = vld [vmem:[#allocation6 + $0x1cc] ss:$16 sps:$4 sm:$0xff]  }
  0xb9   :  { %1858 = vmatpush2.bf16.msra.mxu1 %v3456_v55  ;;  %1818 = vmatprep.subr.bf16.mxu0 %v3461_v56  ;;  %v3552_v55 = vld [vmem:[#allocation6 + $0x3cc] ss:$16 sps:$4 sm:$0xff]   ;;  %v3547_v56 = vld [vmem:[#allocation6 + $0x1c8] ss:$16 sps:$4 sm:$0xff]  }
  0xba   :  { %1859 = vmatprep.subr.bf16.mxu1 %v3464_v57  ;;  %v3550_v57 = vld [vmem:[#allocation6 + $0x3c8] ss:$16 sps:$4 sm:$0xff]  }
  0xbc   :  { %1819 = vmatpush2.bf16.msra.mxu0 %v3459_v58  ;;  %v3555_v58 = vld [vmem:[#allocation6 + $0x1ac] ss:$16 sps:$4 sm:$0xff]  }
  0xbd   :  { %1860 = vmatpush2.bf16.msra.mxu1 %v3462_v59  ;;  %1820 = vmatprep.subr.bf16.mxu0 %v3467_v60  ;;  %v3558_v59 = vld [vmem:[#allocation6 + $0x3ac] ss:$16 sps:$4 sm:$0xff]   ;;  %v3553_v60 = vld [vmem:[#allocation6 + $0x1a8] ss:$16 sps:$4 sm:$0xff]  }
  0xbe   :  { %1861 = vmatprep.subr.bf16.mxu1 %v3470_v61  ;;  %v3556_v61 = vld [vmem:[#allocation6 + $0x3a8] ss:$16 sps:$4 sm:$0xff]  }
  0xc0   :  { %1821 = vmatpush2.bf16.msra.mxu0 %v3465_v62  ;;  %v3561_v62 = vld [vmem:[#allocation6 + $0x18c] ss:$16 sps:$4 sm:$0xff]  }
  0xc1   :  { %1862 = vmatpush2.bf16.msra.mxu1 %v3468_v63  ;;  %1822 = vmatprep.subr.bf16.mxu0 %v3473_v0  ;;  %v3564_v63 = vld [vmem:[#allocation6 + $0x38c] ss:$16 sps:$4 sm:$0xff]   ;;  %v3559_v0 = vld [vmem:[#allocation6 + $0x188] ss:$16 sps:$4 sm:$0xff]  }
  0xc2   :  { %1863 = vmatprep.subr.bf16.mxu1 %v3476_v1  ;;  %v3562_v1 = vld [vmem:[#allocation6 + $0x388] ss:$16 sps:$4 sm:$0xff]  }
  0xc4   :  { %1823 = vmatpush2.bf16.msra.mxu0 %v3471_v2  ;;  %v3567_v2 = vld [vmem:[#allocation6 + $0x16c] ss:$16 sps:$4 sm:$0xff]  }
  0xc5   :  { %1864 = vmatpush2.bf16.msra.mxu1 %v3474_v3  ;;  %1824 = vmatprep.subr.bf16.mxu0 %v3479_v4  ;;  %v3570_v3 = vld [vmem:[#allocation6 + $0x36c] ss:$16 sps:$4 sm:$0xff]   ;;  %v3565_v4 = vld [vmem:[#allocation6 + $0x168] ss:$16 sps:$4 sm:$0xff]  }
  0xc6   :  { %1865 = vmatprep.subr.bf16.mxu1 %v3482_v5  ;;  %v3568_v5 = vld [vmem:[#allocation6 + $0x368] ss:$16 sps:$4 sm:$0xff]  }
  0xc8   :  { %1825 = vmatpush2.bf16.msra.mxu0 %v3477_v8  ;;  %v3573_v8 = vld [vmem:[#allocation6 + $0x14c] ss:$16 sps:$4 sm:$0xff]  }
  0xc9   :  { %1866 = vmatpush2.bf16.msra.mxu1 %v3480_v9  ;;  %1826 = vmatprep.subr.bf16.mxu0 %v3485_v10  ;;  %v3576_v9 = vld [vmem:[#allocation6 + $0x34c] ss:$16 sps:$4 sm:$0xff]   ;;  %v3571_v10 = vld [vmem:[#allocation6 + $0x148] ss:$16 sps:$4 sm:$0xff]  }
  0xca   :  { %1867 = vmatprep.subr.bf16.mxu1 %v3488_v11  ;;  %v3574_v11 = vld [vmem:[#allocation6 + $0x348] ss:$16 sps:$4 sm:$0xff]  }
  0xcc   :  { %1827 = vmatpush2.bf16.msra.mxu0 %v3483_v12  ;;  %v3579_v12 = vld [vmem:[#allocation6 + $0x12c] ss:$16 sps:$4 sm:$0xff]  }
  0xcd   :  { %1868 = vmatpush2.bf16.msra.mxu1 %v3486_v13  ;;  %1878 = vmatprep.subr.bf16.mxu0 %v3495_v14  ;;  %v3582_v13 = vld [vmem:[#allocation6 + $0x32c] ss:$16 sps:$4 sm:$0xff]   ;;  %v3577_v14 = vld [vmem:[#allocation6 + $0x128] ss:$16 sps:$4 sm:$0xff]  }
  0xce   :  { %1919 = vmatprep.subr.bf16.mxu1 %v3498_v15  ;;  %v3580_v15 = vld [vmem:[#allocation6 + $0x328] ss:$16 sps:$4 sm:$0xff]  }
  0xcf   :  { %1829 = vmatmul.mubr.bf16.vlgmr.msra.gmra.mxu0 %v4070_v16 }
  0xd0   :  { %1870 = vmatmul.mubr.bf16.vlgmr.msra.gmra.mxu1 %v4074_v17  ;;  %1879 = vmatpush1.bf16.msra.mxu0 %v3493_v18  ;;  %v3585_v18 = vld [vmem:[#allocation6 + $0x10c] ss:$16 sps:$4 sm:$0xff]  }
  0xd1   :  { %1920 = vmatpush1.bf16.msra.mxu1 %v3496_v19  ;;  %1880 = vmatprep.subr.bf16.mxu0 %v3501_v20  ;;  %v3588_v19 = vld [vmem:[#allocation6 + $0x30c] ss:$16 sps:$4 sm:$0xff]   ;;  %v3583_v20 = vld [vmem:[#allocation6 + $0x108] ss:$16 sps:$4 sm:$0xff]  }
  0xd2   :  { %1921 = vmatprep.subr.bf16.mxu1 %v3504_v21  ;;  %1910 = vmatprep.mubr.bf16.mxu0 %v4042_v47  ;;  %v3520_v47 = vld [vmem:[#allocation6 + $0x268] ss:$16 sps:$4 sm:$0xff]  }
  0xd3   :  { %1951 = vmatprep.mubr.bf16.mxu1 %v4044_v51  ;;  %v3525_v51 = vld [vmem:[#allocation6 + $0x4c] ss:$16 sps:$4 sm:$0xff]   ;;  %v3586_v21 = vld [vmem:[#allocation6 + $0x308] ss:$16 sps:$4 sm:$0xff]  }
  0xd4   :  { %1881 = vmatpush1.bf16.msra.mxu0 %v3499_v22  ;;  %v3591_v22 = vld [vmem:[#allocation6 + $0x4ec] ss:$16 sps:$4 sm:$0xff]  }
  0xd5   :  { %1922 = vmatpush1.bf16.msra.mxu1 %v3502_v23  ;;  %1882 = vmatprep.subr.bf16.mxu0 %v3507_v24  ;;  %v3594_v23 = vld [vmem:[#allocation6 + $0x6ec] ss:$16 sps:$4 sm:$0xff]   ;;  %v3589_v24 = vld [vmem:[#allocation6 + $0x4e8] ss:$16 sps:$4 sm:$0xff]  }
  0xd6   :  { %1923 = vmatprep.subr.bf16.mxu1 %v3510_v25  ;;  %v3592_v25 = vld [vmem:[#allocation6 + $0x6e8] ss:$16 sps:$4 sm:$0xff]  }
  0xd8   :  { %1883 = vmatpush1.bf16.msra.mxu0 %v3505_v26  ;;  %v3597_v26 = vld [vmem:[#allocation6 + $0x4cc] ss:$16 sps:$4 sm:$0xff]  }
  0xd9   :  { %1924 = vmatpush1.bf16.msra.mxu1 %v3508_v27  ;;  %1884 = vmatprep.subr.bf16.mxu0 %v3513_v28  ;;  %v3600_v27 = vld [vmem:[#allocation6 + $0x6cc] ss:$16 sps:$4 sm:$0xff]   ;;  %v3595_v28 = vld [vmem:[#allocation6 + $0x4c8] ss:$16 sps:$4 sm:$0xff]  }
  0xda   :  { %1925 = vmatprep.subr.bf16.mxu1 %v3516_v29  ;;  %v3598_v29 = vld [vmem:[#allocation6 + $0x6c8] ss:$16 sps:$4 sm:$0xff]  }
  0xdc   :  { %1885 = vmatpush1.bf16.msra.mxu0 %v3511_v30  ;;  %v3603_v30 = vld [vmem:[#allocation6 + $0x4ac] ss:$16 sps:$4 sm:$0xff]  }
  0xdd   :  { %1926 = vmatpush1.bf16.msra.mxu1 %v3514_v31  ;;  %1886 = vmatprep.subr.bf16.mxu0 %v3519_v32  ;;  %v3606_v31 = vld [vmem:[#allocation6 + $0x6ac] ss:$16 sps:$4 sm:$0xff]   ;;  %v3601_v32 = vld [vmem:[#allocation6 + $0x4a8] ss:$16 sps:$4 sm:$0xff]  }
  0xde   :  { %1927 = vmatprep.subr.bf16.mxu1 %v3522_v33  ;;  %v3604_v33 = vld [vmem:[#allocation6 + $0x6a8] ss:$16 sps:$4 sm:$0xff]  }
  0xe0   :  { %1887 = vmatpush1.bf16.msra.mxu0 %v3517_v34  ;;  %v3609_v34 = vld [vmem:[#allocation6 + $0x48c] ss:$16 sps:$4 sm:$0xff]  }
  0xe1   :  { %1928 = vmatpush1.bf16.msra.mxu1 %v3520_v47  ;;  %1888 = vmatprep.subr.bf16.mxu0 %v3525_v51  ;;  %v3610_v47 = vld [vmem:[#allocation6 + $0x688] ss:$16 sps:$4 sm:$0xff]   ;;  %v3615_v51 = vld [vmem:[#allocation6 + $0x46c] ss:$16 sps:$4 sm:$0xff]  }
  0xe2   :  { %1929 = vmatprep.subr.bf16.mxu1 %v3528_v35  ;;  %v3618_v35 = vld [vmem:[#allocation6 + $0x66c] ss:$16 sps:$4 sm:$0xff]  }
  0xe4   :  { %1889 = vmatpush1.bf16.msra.mxu0 %v3523_v38  ;;  %v3613_v38 = vld [vmem:[#allocation6 + $0x468] ss:$16 sps:$4 sm:$0xff]  }
  0xe5   :  { %1930 = vmatpush1.bf16.msra.mxu1 %v3526_v39  ;;  %1890 = vmatprep.subr.bf16.mxu0 %v3531_v40  ;;  %v3616_v39 = vld [vmem:[#allocation6 + $0x668] ss:$16 sps:$4 sm:$0xff]   ;;  %v3621_v40 = vld [vmem:[#allocation6 + $0x44c] ss:$16 sps:$4 sm:$0xff]  }
  0xe6   :  { %1931 = vmatprep.subr.bf16.mxu1 %v3534_v41  ;;  %v3622_v41 = vld [vmem:[#allocation6 + $0x648] ss:$16 sps:$4 sm:$0xff]  }
  0xe8   :  { %1891 = vmatpush1.bf16.msra.mxu0 %v3529_v42  ;;  %v3627_v42 = vld [vmem:[#allocation6 + $0x42c] ss:$16 sps:$4 sm:$0xff]  }
  0xe9   :  { %1932 = vmatpush1.bf16.msra.mxu1 %v3532_v43  ;;  %1892 = vmatprep.subr.bf16.mxu0 %v3537_v44  ;;  %v3630_v43 = vld [vmem:[#allocation6 + $0x62c] ss:$16 sps:$4 sm:$0xff]   ;;  %v3625_v44 = vld [vmem:[#allocation6 + $0x428] ss:$16 sps:$4 sm:$0xff]  }
  0xea   :  { %1933 = vmatprep.subr.bf16.mxu1 %v3540_v45  ;;  %v3628_v45 = vld [vmem:[#allocation6 + $0x628] ss:$16 sps:$4 sm:$0xff]  }
  0xec   :  { %1893 = vmatpush1.bf16.msra.mxu0 %v3535_v46  ;;  %v3633_v46 = vld [vmem:[#allocation6 + $0x40c] ss:$16 sps:$4 sm:$0xff]  }
  0xed   :  { %1934 = vmatpush1.bf16.msra.mxu1 %v3538_v48  ;;  %1894 = vmatprep.subr.bf16.mxu0 %v3543_v49  ;;  %v3636_v48 = vld [vmem:[#allocation6 + $0x60c] ss:$16 sps:$4 sm:$0xff]   ;;  %v3631_v49 = vld [vmem:[#allocation6 + $0x408] ss:$16 sps:$4 sm:$0xff]  }
  0xee   :  { %1935 = vmatprep.subr.bf16.mxu1 %v3546_v50  ;;  %v3634_v50 = vld [vmem:[#allocation6 + $0x608] ss:$16 sps:$4 sm:$0xff]  }
  0xf0   :  { %1895 = vmatpush2.bf16.msra.mxu0 %v3541_v52  ;;  %v3639_v52 = vld [vmem:[#allocation6 + $0x5ec] ss:$16 sps:$4 sm:$0xff]  }
  0xf1   :  { %1936 = vmatpush2.bf16.msra.mxu1 %v3544_v53  ;;  %1896 = vmatprep.subr.bf16.mxu0 %v3549_v54  ;;  %v3642_v53 = vld [vmem:[#allocation6 + $0x7ec] ss:$16 sps:$4 sm:$0xff]   ;;  %v3637_v54 = vld [vmem:[#allocation6 + $0x5e8] ss:$16 sps:$4 sm:$0xff]  }
  0xf2   :  { %1937 = vmatprep.subr.bf16.mxu1 %v3552_v55  ;;  %v3640_v55 = vld [vmem:[#allocation6 + $0x7e8] ss:$16 sps:$4 sm:$0xff]  }
  0xf4   :  { %1897 = vmatpush2.bf16.msra.mxu0 %v3547_v56  ;;  %v3645_v56 = vld [vmem:[#allocation6 + $0x5cc] ss:$16 sps:$4 sm:$0xff]  }
  0xf5   :  { %1938 = vmatpush2.bf16.msra.mxu1 %v3550_v57  ;;  %1898 = vmatprep.subr.bf16.mxu0 %v3555_v58  ;;  %v3648_v57 = vld [vmem:[#allocation6 + $0x7cc] ss:$16 sps:$4 sm:$0xff]   ;;  %v3643_v58 = vld [vmem:[#allocation6 + $0x5c8] ss:$16 sps:$4 sm:$0xff]  }
  0xf6   :  { %1939 = vmatprep.subr.bf16.mxu1 %v3558_v59  ;;  %v3646_v59 = vld [vmem:[#allocation6 + $0x7c8] ss:$16 sps:$4 sm:$0xff]  }
  0xf8   :  { %1899 = vmatpush2.bf16.msra.mxu0 %v3553_v60  ;;  %v3651_v60 = vld [vmem:[#allocation6 + $0x5ac] ss:$16 sps:$4 sm:$0xff]  }
  0xf9   :  { %1940 = vmatpush2.bf16.msra.mxu1 %v3556_v61  ;;  %1900 = vmatprep.subr.bf16.mxu0 %v3561_v62  ;;  %v3654_v61 = vld [vmem:[#allocation6 + $0x7ac] ss:$16 sps:$4 sm:$0xff]   ;;  %v3649_v62 = vld [vmem:[#allocation6 + $0x5a8] ss:$16 sps:$4 sm:$0xff]  }
  0xfa   :  { %1941 = vmatprep.subr.bf16.mxu1 %v3564_v63  ;;  %v3652_v63 = vld [vmem:[#allocation6 + $0x7a8] ss:$16 sps:$4 sm:$0xff]  }
  0xfc   :  { %1901 = vmatpush2.bf16.msra.mxu0 %v3559_v0  ;;  %v3657_v0 = vld [vmem:[#allocation6 + $0x58c] ss:$16 sps:$4 sm:$0xff]  }
  0xfd   :  { %1942 = vmatpush2.bf16.msra.mxu1 %v3562_v1  ;;  %1902 = vmatprep.subr.bf16.mxu0 %v3567_v2  ;;  %v3660_v1 = vld [vmem:[#allocation6 + $0x78c] ss:$16 sps:$4 sm:$0xff]   ;;  %v3655_v2 = vld [vmem:[#allocation6 + $0x588] ss:$16 sps:$4 sm:$0xff]  }
  0xfe   :  { %1943 = vmatprep.subr.bf16.mxu1 %v3570_v3  ;;  %v3658_v3 = vld [vmem:[#allocation6 + $0x788] ss:$16 sps:$4 sm:$0xff]  }
 0x100   :  { %1903 = vmatpush2.bf16.msra.mxu0 %v3565_v4  ;;  %v3663_v4 = vld [vmem:[#allocation6 + $0x56c] ss:$16 sps:$4 sm:$0xff]  }
 0x101   :  { %1944 = vmatpush2.bf16.msra.mxu1 %v3568_v5  ;;  %1904 = vmatprep.subr.bf16.mxu0 %v3573_v8  ;;  %v3666_v5 = vld [vmem:[#allocation6 + $0x76c] ss:$16 sps:$4 sm:$0xff]   ;;  %v3661_v8 = vld [vmem:[#allocation6 + $0x568] ss:$16 sps:$4 sm:$0xff]  }
 0x102   :  { %1945 = vmatprep.subr.bf16.mxu1 %v3576_v9  ;;  %v3664_v9 = vld [vmem:[#allocation6 + $0x768] ss:$16 sps:$4 sm:$0xff]  }
 0x104   :  { %1905 = vmatpush2.bf16.msra.mxu0 %v3571_v10  ;;  %v3669_v10 = vld [vmem:[#allocation6 + $0x54c] ss:$16 sps:$4 sm:$0xff]  }
 0x105   :  { %1946 = vmatpush2.bf16.msra.mxu1 %v3574_v11  ;;  %1906 = vmatprep.subr.bf16.mxu0 %v3579_v12  ;;  %v3672_v11 = vld [vmem:[#allocation6 + $0x74c] ss:$16 sps:$4 sm:$0xff]   ;;  %v3667_v12 = vld [vmem:[#allocation6 + $0x548] ss:$16 sps:$4 sm:$0xff]  }
 0x106   :  { %1947 = vmatprep.subr.bf16.mxu1 %v3582_v13  ;;  %v3670_v13 = vld [vmem:[#allocation6 + $0x748] ss:$16 sps:$4 sm:$0xff]  }
 0x108   :  { %1907 = vmatpush2.bf16.msra.mxu0 %v3577_v14  ;;  %v3675_v14 = vld [vmem:[#allocation6 + $0x52c] ss:$16 sps:$4 sm:$0xff]  }
 0x109   :  { %1948 = vmatpush2.bf16.msra.mxu1 %v3580_v15  ;;  %1908 = vmatprep.subr.bf16.mxu0 %v3585_v18  ;;  %v3678_v15 = vld [vmem:[#allocation6 + $0x72c] ss:$16 sps:$4 sm:$0xff]   ;;  %v3673_v18 = vld [vmem:[#allocation6 + $0x528] ss:$16 sps:$4 sm:$0xff]  }
 0x10a   :  { %1949 = vmatprep.subr.bf16.mxu1 %v3588_v19  ;;  %v3676_v19 = vld [vmem:[#allocation6 + $0x728] ss:$16 sps:$4 sm:$0xff]  }
 0x10c   :  { %1909 = vmatpush2.bf16.msra.mxu0 %v3583_v20  ;;  %v3681_v20 = vld [vmem:[#allocation6 + $0x50c] ss:$16 sps:$4 sm:$0xff]  }
 0x10d   :  { %1950 = vmatpush2.bf16.msra.mxu1 %v3586_v21  ;;  %1960 = vmatprep.subr.bf16.mxu0 %v3591_v22  ;;  %v3684_v21 = vld [vmem:[#allocation6 + $0x70c] ss:$16 sps:$4 sm:$0xff]   ;;  %v3679_v22 = vld [vmem:[#allocation6 + $0x508] ss:$16 sps:$4 sm:$0xff]  }
 0x10e   :  { %2001 = vmatprep.subr.bf16.mxu1 %v3594_v23  ;;  %v3682_v23 = vld [vmem:[#allocation6 + $0x708] ss:$16 sps:$4 sm:$0xff]  }
 0x10f   :  { %1911 = vmatmul.mubr.bf16.vlgmr.msra.gmra.mxu0 %v4048_v6  ;;  %v3612_v6 = vld [vmem:[#allocation6 + $0x68c] ss:$16 sps:$4 sm:$0xff]  }
 0x110   :  { %1952 = vmatmul.mubr.bf16.vlgmr.msra.gmra.mxu1 %v4050_v7  ;;  %1961 = vmatpush1.bf16.msra.mxu0 %v3589_v24  ;;  %v3607_v7 = vld [vmem:[#allocation6 + $0x488] ss:$16 sps:$4 sm:$0xff]  }
 0x111   :  { %2002 = vmatpush1.bf16.msra.mxu1 %v3592_v25  ;;  %1962 = vmatprep.subr.bf16.mxu0 %v3597_v26  ;;  %v3687_v24 = vld [vmem:[#allocation9 + $0x74] ss:$8 sps:$4 sm:$0xff]   ;;  %v3685_v25 = vld [vmem:[#allocation9 + $0x70] ss:$8 sps:$4 sm:$0xff]   ;;  %v3690_v26 = vld [vmem:[#allocation9 + $0x64] ss:$8 sps:$4 sm:$0xff]  }
 0x112   :  { %2003 = vmatprep.subr.bf16.mxu1 %v3600_v27  ;;  %1992 = vmatprep.mubr.bf16.mxu0 %v4060_v36  ;;  %v3624_v36 = vld [vmem:[#allocation6 + $0x64c] ss:$16 sps:$4 sm:$0xff]  }
 0x113   :  { %2033 = vmatprep.mubr.bf16.mxu1 %v4064_v37  ;;  %v3619_v37 = vld [vmem:[#allocation6 + $0x448] ss:$16 sps:$4 sm:$0xff]  }
 0x114   :  { %1963 = vmatpush1.bf16.msra.mxu0 %v3595_v28 }
 0x115   :  { %2004 = vmatpush1.bf16.msra.mxu1 %v3598_v29  ;;  %1964 = vmatprep.subr.bf16.mxu0 %v3603_v30  ;;  %v3688_v30 = vld [vmem:[#allocation9 + $0x60] ss:$8 sps:$4 sm:$0xff]  }
 0x116   :  { %2005 = vmatprep.subr.bf16.mxu1 %v3606_v31 }
 0x118   :  { %1965 = vmatpush1.bf16.msra.mxu0 %v3601_v32 }
 0x119   :  { %2006 = vmatpush1.bf16.msra.mxu1 %v3604_v33  ;;  %1966 = vmatprep.subr.bf16.mxu0 %v3609_v34  ;;  %v3693_v33 = vld [vmem:[#allocation9 + $0x54] ss:$8 sps:$4 sm:$0xff]  }
 0x11a   :  { %2007 = vmatprep.subr.bf16.mxu1 %v3612_v6 }
 0x11c   :  { %1967 = vmatpush1.bf16.msra.mxu0 %v3607_v7  ;;  %v3691_v7 = vld [vmem:[#allocation9 + $0x50] ss:$8 sps:$4 sm:$0xff]  }
 0x11d   :  { %2008 = vmatpush1.bf16.msra.mxu1 %v3610_v47  ;;  %1968 = vmatprep.subr.bf16.mxu0 %v3615_v51 }
 0x11e   :  { %2009 = vmatprep.subr.bf16.mxu1 %v3618_v35  ;;  %v3733_v35 = vld [vmem:[#allocation9 + $0x170] ss:$8 sps:$4 sm:$0xff]  }
 0x120   :  { %1969 = vmatpush1.bf16.msra.mxu0 %v3613_v38  ;;  %v3738_v38 = vld [vmem:[#allocation9 + $0x164] ss:$8 sps:$4 sm:$0xff]  }
 0x121   :  { %2010 = vmatpush1.bf16.msra.mxu1 %v3616_v39  ;;  %1970 = vmatprep.subr.bf16.mxu0 %v3621_v40  ;;  %v3694_v39 = vld [vmem:[#allocation9 + $0x40] ss:$8 sps:$4 sm:$0xff]  }
 0x122   :  { %2011 = vmatprep.subr.bf16.mxu1 %v3624_v36  ;;  %v3736_v40 = vld [vmem:[#allocation9 + $0x160] ss:$8 sps:$4 sm:$0xff]   ;;  %v3699_v36 = vld [vmem:[#allocation9 + $0x34] ss:$8 sps:$4 sm:$0xff]  }
 0x124   :  { %1971 = vmatpush1.bf16.msra.mxu0 %v3619_v37  ;;  %v3741_v37 = vld [vmem:[#allocation9 + $0x154] ss:$8 sps:$4 sm:$0xff]  }
 0x125   :  { %2012 = vmatpush1.bf16.msra.mxu1 %v3622_v41  ;;  %1972 = vmatprep.subr.bf16.mxu0 %v3627_v42  ;;  %v3697_v41 = vld [vmem:[#allocation9 + $0x30] ss:$8 sps:$4 sm:$0xff]  }
 0x126   :  { %2013 = vmatprep.subr.bf16.mxu1 %v3630_v43  ;;  %v3739_v42 = vld [vmem:[#allocation9 + $0x150] ss:$8 sps:$4 sm:$0xff]   ;;  %v3702_v43 = vld [vmem:[#allocation9 + $0x24] ss:$8 sps:$4 sm:$0xff]  }
 0x128   :  { %1973 = vmatpush1.bf16.msra.mxu0 %v3625_v44  ;;  %v3744_v44 = vld [vmem:[#allocation9 + $0x144] ss:$8 sps:$4 sm:$0xff]  }
 0x129   :  { %2014 = vmatpush1.bf16.msra.mxu1 %v3628_v45  ;;  %1974 = vmatprep.subr.bf16.mxu0 %v3633_v46  ;;  %v3700_v45 = vld [vmem:[#allocation9 + $0x20] ss:$8 sps:$4 sm:$0xff]  }
 0x12a   :  { %2015 = vmatprep.subr.bf16.mxu1 %v3636_v48  ;;  %v3742_v46 = vld [vmem:[#allocation9 + $0x140] ss:$8 sps:$4 sm:$0xff]   ;;  %v3705_v48 = vld [vmem:[#allocation9 + $0x14] ss:$8 sps:$4 sm:$0xff]  }
 0x12c   :  { %1975 = vmatpush1.bf16.msra.mxu0 %v3631_v49  ;;  %v3747_v49 = vld [vmem:[#allocation9 + $0x134] ss:$8 sps:$4 sm:$0xff]  }
 0x12d   :  { %2016 = vmatpush1.bf16.msra.mxu1 %v3634_v50  ;;  %1976 = vmatprep.subr.bf16.mxu0 %v3639_v52  ;;  %v3703_v50 = vld [vmem:[#allocation9 + $0x10] ss:$8 sps:$4 sm:$0xff]  }
 0x12e   :  { %2017 = vmatprep.subr.bf16.mxu1 %v3642_v53  ;;  %v3745_v52 = vld [vmem:[#allocation9 + $0x130] ss:$8 sps:$4 sm:$0xff]   ;;  %v3708_v53 = vld [vmem:[#allocation9 + $0x4] ss:$8 sps:$4 sm:$0xff]  }
 0x130   :  { %1977 = vmatpush2.bf16.msra.mxu0 %v3637_v54  ;;  %v3750_v54 = vld [vmem:[#allocation9 + $0x124] ss:$8 sps:$4 sm:$0xff]  }
 0x131   :  { %2018 = vmatpush2.bf16.msra.mxu1 %v3640_v55  ;;  %1978 = vmatprep.subr.bf16.mxu0 %v3645_v56  ;;  %v3706_v55 = vld [vmem:[#allocation9] ss:$8 sps:$4 sm:$0xff]  }
 0x132   :  { %2019 = vmatprep.subr.bf16.mxu1 %v3648_v57  ;;  %v3748_v56 = vld [vmem:[#allocation9 + $0x120] ss:$8 sps:$4 sm:$0xff]   ;;  %v3711_v57 = vld [vmem:[#allocation9 + $0xf4] ss:$8 sps:$4 sm:$0xff]  }
 0x134   :  { %1979 = vmatpush2.bf16.msra.mxu0 %v3643_v58  ;;  %v3753_v58 = vld [vmem:[#allocation9 + $0x114] ss:$8 sps:$4 sm:$0xff]  }
 0x135   :  { %2020 = vmatpush2.bf16.msra.mxu1 %v3646_v59  ;;  %1980 = vmatprep.subr.bf16.mxu0 %v3651_v60  ;;  %v3709_v59 = vld [vmem:[#allocation9 + $0xf0] ss:$8 sps:$4 sm:$0xff]  }
 0x136   :  { %2021 = vmatprep.subr.bf16.mxu1 %v3654_v61  ;;  %v3751_v60 = vld [vmem:[#allocation9 + $0x110] ss:$8 sps:$4 sm:$0xff]   ;;  %v3714_v61 = vld [vmem:[#allocation9 + $0xe4] ss:$8 sps:$4 sm:$0xff]  }
 0x138   :  { %1981 = vmatpush2.bf16.msra.mxu0 %v3649_v62  ;;  %v3756_v62 = vld [vmem:[#allocation9 + $0x104] ss:$8 sps:$4 sm:$0xff]  }
 0x139   :  { %2022 = vmatpush2.bf16.msra.mxu1 %v3652_v63  ;;  %1982 = vmatprep.subr.bf16.mxu0 %v3657_v0  ;;  %v3712_v63 = vld [vmem:[#allocation9 + $0xe0] ss:$8 sps:$4 sm:$0xff]  }
 0x13a   :  { %2023 = vmatprep.subr.bf16.mxu1 %v3660_v1  ;;  %v3754_v0 = vld [vmem:[#allocation9 + $0x100] ss:$8 sps:$4 sm:$0xff]   ;;  %v3717_v1 = vld [vmem:[#allocation9 + $0xd4] ss:$8 sps:$4 sm:$0xff]  }
 0x13c   :  { %1983 = vmatpush2.bf16.msra.mxu0 %v3655_v2  ;;  %v3759_v2 = vld [vmem:[#allocation9 + $0x1f4] ss:$8 sps:$4 sm:$0xff]  }
 0x13d   :  { %2024 = vmatpush2.bf16.msra.mxu1 %v3658_v3  ;;  %1984 = vmatprep.subr.bf16.mxu0 %v3663_v4  ;;  %v3715_v3 = vld [vmem:[#allocation9 + $0xd0] ss:$8 sps:$4 sm:$0xff]  }
 0x13e   :  { %2025 = vmatprep.subr.bf16.mxu1 %v3666_v5  ;;  %v3757_v4 = vld [vmem:[#allocation9 + $0x1f0] ss:$8 sps:$4 sm:$0xff]   ;;  %v3720_v5 = vld [vmem:[#allocation9 + $0xc4] ss:$8 sps:$4 sm:$0xff]  }
 0x140   :  { %1985 = vmatpush2.bf16.msra.mxu0 %v3661_v8  ;;  %v3762_v8 = vld [vmem:[#allocation9 + $0x1e4] ss:$8 sps:$4 sm:$0xff]  }
 0x141   :  { %2026 = vmatpush2.bf16.msra.mxu1 %v3664_v9  ;;  %1986 = vmatprep.subr.bf16.mxu0 %v3669_v10  ;;  %v3718_v9 = vld [vmem:[#allocation9 + $0xc0] ss:$8 sps:$4 sm:$0xff]  }
 0x142   :  { %2027 = vmatprep.subr.bf16.mxu1 %v3672_v11  ;;  %v3760_v10 = vld [vmem:[#allocation9 + $0x1e0] ss:$8 sps:$4 sm:$0xff]   ;;  %v3723_v11 = vld [vmem:[#allocation9 + $0xb4] ss:$8 sps:$4 sm:$0xff]  }
 0x144   :  { %1987 = vmatpush2.bf16.msra.mxu0 %v3667_v12  ;;  %v3765_v12 = vld [vmem:[#allocation9 + $0x1d4] ss:$8 sps:$4 sm:$0xff]  }
 0x145   :  { %2028 = vmatpush2.bf16.msra.mxu1 %v3670_v13  ;;  %1988 = vmatprep.subr.bf16.mxu0 %v3675_v14  ;;  %v3721_v13 = vld [vmem:[#allocation9 + $0xb0] ss:$8 sps:$4 sm:$0xff]  }
 0x146   :  { %2029 = vmatprep.subr.bf16.mxu1 %v3678_v15  ;;  %v3763_v14 = vld [vmem:[#allocation9 + $0x1d0] ss:$8 sps:$4 sm:$0xff]   ;;  %v3726_v15 = vld [vmem:[#allocation9 + $0xa4] ss:$8 sps:$4 sm:$0xff]  }
 0x148   :  { %1989 = vmatpush2.bf16.msra.mxu0 %v3673_v18  ;;  %v3768_v18 = vld [vmem:[#allocation9 + $0x1c4] ss:$8 sps:$4 sm:$0xff]  }
 0x149   :  { %2030 = vmatpush2.bf16.msra.mxu1 %v3676_v19  ;;  %1990 = vmatprep.subr.bf16.mxu0 %v3681_v20  ;;  %v3724_v19 = vld [vmem:[#allocation9 + $0xa0] ss:$8 sps:$4 sm:$0xff]  }
 0x14a   :  { %2031 = vmatprep.subr.bf16.mxu1 %v3684_v21  ;;  %v3766_v20 = vld [vmem:[#allocation9 + $0x1c0] ss:$8 sps:$4 sm:$0xff]   ;;  %v3729_v21 = vld [vmem:[#allocation9 + $0x94] ss:$8 sps:$4 sm:$0xff]  }
 0x14c   :  { %1991 = vmatpush2.bf16.msra.mxu0 %v3679_v22  ;;  %v3771_v22 = vld [vmem:[#allocation9 + $0x1b4] ss:$8 sps:$4 sm:$0xff]  }
 0x14d   :  { %2032 = vmatpush2.bf16.msra.mxu1 %v3682_v23  ;;  %2469 = vmatprep.subr.bf16.mxu0 %v3687_v24  ;;  %v118_v23 = vlaneseq  ;;  %v3727_v24 = vld [vmem:[#allocation9 + $0x90] ss:$8 sps:$4 sm:$0xff]  }
 0x14f   :  { %v1748_v27 = vpop.f32.mrf.mxu0  ;;  %1993 = vmatmul.mubr.bf16.vlgmr.msra.gmra.mxu0 %v4070_v16  ;;  %v3696_v16 = vld [vmem:[#allocation9 + $0x44] ss:$8 sps:$4 sm:$0xff]  }
 0x150   :  { %v1789_v28 = vpop.f32.mrf.mxu1  ;;  %2034 = vmatmul.mubr.bf16.vlgmr.msra.gmra.mxu1 %v4074_v17  ;;  %2470 = vmatpush1.bf16.msra.mxu0 %v3685_v25  ;;  %v3735_v17 = vld [vmem:[#allocation9 + $0x174] ss:$8 sps:$4 sm:$0xff]   ;;  %v3769_v25 = vld [vmem:[#allocation9 + $0x1b0] ss:$8 sps:$4 sm:$0xff]  }
 0x151   :  { %v4086_v29 = vadd.f32 %v1789_v28, %v1748_v27  ;;  %v4088_v31 = vpop.f32.mrf.mxu0  ;;  %2471 = vmatprep.subr.bf16.mxu0 %v3690_v26  ;;  %2510 = vmatprep.subr.bf16.mxu1 %v3735_v17  ;;  %v3732_v26 = vld [vmem:[#allocation9 + $0x84] ss:$8 sps:$4 sm:$0xff]   ;;  %v4092_v27 = vshrl.u32 %v118_v23, 7  ;;  %v3730_v28 = vld [vmem:[#allocation9 + $0x80] ss:$8 sps:$4 sm:$0xff]  }
 0x152   :  { %v4090_v32 = vpop.f32.mrf.mxu1  ;;  %2511 = vmatpush1.bf16.msra.mxu1 %v3733_v35  ;;  %v3774_v35 = vld [vmem:[#allocation9 + $0x1a4] ss:$8 sps:$4 sm:$0xff]  }
 0x153   :  { %v1752_v34 = vpop.f32.mrf.mxu0  ;;  %2512 = vmatprep.subr.bf16.mxu1 %v3738_v38 }
 0x154   :  { %v1793_v6 = vpop.f32.mrf.mxu1  ;;  %2472 = vmatpush1.bf16.msra.mxu0 %v3688_v30  ;;  %v120_v30 = vsub.s32 0, %v4092_v27  ;;  %v124_v34 = vsub.s32 1, %v4092_v27 }
 0x155   :  { %v1753_v47 = vpop.f32.mrf.mxu0  ;;  %2473 = vmatprep.subr.bf16.mxu0 %v3693_v33  ;;  %v4095_v33 = vld [vmem:[#allocation8] sm:$0xf] }
 0x156   :  { %v1794_v51 = vpop.f32.mrf.mxu1  ;;  %2513 = vmatpush1.bf16.msra.mxu1 %v3736_v40  ;;  %v1792_v47 = vadd.f32 %v4090_v32, %v4088_v31  ;;  %v3777_v32 = vld [vmem:[#allocation9 + $0x194] ss:$8 sps:$4 sm:$0xff]  }
 0x157   :  { %2514 = vmatprep.subr.bf16.mxu1 %v3741_v37  ;;  %v125_v37 = vrot.slane %v4095_v33, %v124_v34 }
 0x158   :  { %2474 = vmatpush1.bf16.msra.mxu0 %v3691_v7 }
 0x159   :  { %2475 = vmatprep.subr.bf16.mxu0 %v3696_v16  ;;  %v121_v16 = vrot.slane %v4095_v33, %v120_v30 }
 0x15a   :  { %2515 = vmatpush1.bf16.msra.mxu1 %v3739_v42 }
 0x15b   :  { %2516 = vmatprep.subr.bf16.mxu1 %v3744_v44 }
 0x15c   :  { %2476 = vmatpush1.bf16.msra.mxu0 %v3694_v39  ;;  %v3772_v39 = vld [vmem:[#allocation9 + $0x1a0] ss:$8 sps:$4 sm:$0xff]  }
 0x15d   :  { %2477 = vmatprep.subr.bf16.mxu0 %v3699_v36 }
 0x15e   :  { %2517 = vmatpush1.bf16.msra.mxu1 %v3742_v46 }
 0x15f   :  { %2518 = vmatprep.subr.bf16.mxu1 %v3747_v49 }
 0x160   :  { %2478 = vmatpush1.bf16.msra.mxu0 %v3697_v41 }
 0x161   :  { %2479 = vmatprep.subr.bf16.mxu0 %v3702_v43 }
 0x162   :  { %2519 = vmatpush1.bf16.msra.mxu1 %v3745_v52 }
 0x163   :  { %2520 = vmatprep.subr.bf16.mxu1 %v3750_v54 }
 0x164   :  { %2480 = vmatpush1.bf16.msra.mxu0 %v3700_v45  ;;  %v3775_v45 = vld [vmem:[#allocation9 + $0x190] ss:$8 sps:$4 sm:$0xff]  }
 0x165   :  { %2481 = vmatprep.subr.bf16.mxu0 %v3705_v48 }
 0x166   :  { %2521 = vmatpush1.bf16.msra.mxu1 %v3748_v56 }
 0x167   :  { %2522 = vmatprep.subr.bf16.mxu1 %v3753_v58 }
 0x168   :  { %2482 = vmatpush1.bf16.msra.mxu0 %v3703_v50  ;;  %v3780_v50 = vld [vmem:[#allocation9 + $0x184] ss:$8 sps:$4 sm:$0xff]  }
 0x169   :  { %2483 = vmatprep.subr.bf16.mxu0 %v3708_v53  ;;  %v3778_v53 = vld [vmem:[#allocation9 + $0x180] ss:$8 sps:$4 sm:$0xff]  }
 0x16a   :  { %2523 = vmatpush1.bf16.msra.mxu1 %v3751_v60 }
 0x16b   :  { %2524 = vmatprep.subr.bf16.mxu1 %v3756_v62 }
 0x16c   :  { %2484 = vmatpush1.bf16.msra.mxu0 %v3706_v55 }
 0x16d   :  { %2485 = vmatprep.subr.bf16.mxu0 %v3711_v57 }
 0x16e   :  { %2525 = vmatpush1.bf16.msra.mxu1 %v3754_v0 }
 0x16f   :  { %2526 = vmatprep.subr.bf16.mxu1 %v3759_v2  ;;  %v3781_v2 = vld [vmem:[#allocation11 + $0x78] sm:$0xff]  }
 0x170   :  { %2486 = vmatpush2.bf16.msra.mxu0 %v3709_v59 }
 0x171   :  { %2487 = vmatprep.subr.bf16.mxu0 %v3714_v61 }
 0x172   :  { %2527 = vmatpush2.bf16.msra.mxu1 %v3757_v4  ;;  %v3783_v4 = vld [vmem:[#allocation11 + $0x70] sm:$0xff]  }
 0x173   :  { %2528 = vmatprep.subr.bf16.mxu1 %v3762_v8  ;;  %v3785_v8 = vld [vmem:[#allocation11 + $0x68] sm:$0xff]  }
 0x174   :  { %2488 = vmatpush2.bf16.msra.mxu0 %v3712_v63 }
 0x175   :  { %2489 = vmatprep.subr.bf16.mxu0 %v3717_v1 }
 0x176   :  { %2529 = vmatpush2.bf16.msra.mxu1 %v3760_v10  ;;  %v3787_v10 = vld [vmem:[#allocation11 + $0x60] sm:$0xff]  }
 0x177   :  { %2530 = vmatprep.subr.bf16.mxu1 %v3765_v12  ;;  %v3789_v12 = vld [vmem:[#allocation11 + $0x58] sm:$0xff]  }
 0x178   :  { %2490 = vmatpush2.bf16.msra.mxu0 %v3715_v3  ;;  %v3782_v3 = vld [vmem:[#allocation11 + $0x38] sm:$0xff]  }
 0x179   :  { %2491 = vmatprep.subr.bf16.mxu0 %v3720_v5  ;;  %v3784_v5 = vld [vmem:[#allocation11 + $0x30] sm:$0xff]  }
 0x17a   :  { %2531 = vmatpush2.bf16.msra.mxu1 %v3763_v14  ;;  %v3791_v14 = vld [vmem:[#allocation11 + $0x50] sm:$0xff]  }
 0x17b   :  { %2532 = vmatprep.subr.bf16.mxu1 %v3768_v18  ;;  %v132_v18 = vsub.s32 3, %v4092_v27 }
 0x17c   :  { %2492 = vmatpush2.bf16.msra.mxu0 %v3718_v9  ;;  %v3786_v9 = vld [vmem:[#allocation11 + $0x28] sm:$0xff]  }
 0x17d   :  { %2493 = vmatprep.subr.bf16.mxu0 %v3723_v11  ;;  %v3788_v11 = vld [vmem:[#allocation11 + $0x20] sm:$0xff]  }
 0x17e   :  { %2533 = vmatpush2.bf16.msra.mxu1 %v3766_v20 }
 0x17f   :  { %2534 = vmatprep.subr.bf16.mxu1 %v3771_v22 }
 0x180   :  { %2494 = vmatpush2.bf16.msra.mxu0 %v3721_v13  ;;  %v3790_v13 = vld [vmem:[#allocation11 + $0x18] sm:$0xff]  }
 0x181   :  { %2495 = vmatprep.subr.bf16.mxu0 %v3726_v15  ;;  %v128_v15 = vsub.s32 2, %v4092_v27  ;;  %v3802_v27 = vld [vmem:[#allocation12 + $0x10] sm:$0xff]  }
 0x182   :  { %2535 = vmatpush2.bf16.msra.mxu1 %v3769_v25 }
 0x183   :  { %2536 = vmatprep.subr.bf16.mxu1 %v3774_v35  ;;  %v129_v23 = vrot.slane %v4095_v33, %v128_v15 }
 0x184   :  { %2496 = vmatpush2.bf16.msra.mxu0 %v3724_v19 }
 0x185   :  { %2497 = vmatprep.subr.bf16.mxu0 %v3729_v21 }
 0x186   :  { %2537 = vmatpush2.bf16.msra.mxu1 %v3772_v39 }
 0x187   :  { %2538 = vmatprep.subr.bf16.mxu1 %v3777_v32 }
 0x188   :  { %2498 = vmatpush2.bf16.msra.mxu0 %v3727_v24 }
 0x189   :  { %2499 = vmatprep.subr.bf16.mxu0 %v3732_v26 }
 0x18a   :  { %2539 = vmatpush2.bf16.msra.mxu1 %v3775_v45  ;;  %v3795_v45 = vld [vmem:[#allocation11 + $0x40] sm:$0xff]  }
 0x18b   :  { %2540 = vmatprep.subr.bf16.mxu1 %v3780_v50  ;;  %v3971_v50 = vmov 0.0  }
 0x18c   :  { %2500 = vmatpush2.bf16.msra.mxu0 %v3730_v28 }
 0x18d   :  { %3227 = vmatprep.subr.bf16.mxu0 %v3781_v2 }
 0x18e   :  { %2541 = vmatpush2.bf16.msra.mxu1 %v3778_v53  ;;  %v3799_v53 = vld [vmem:[#allocation12 + $0x28] sm:$0xff]  }
 0x18f   :  { %v1830_v6 = vpop.f32.mrf.mxu0  ;;  %3258 = vmatprep.subr.bf16.mxu1 %v3971_v50 }
 0x190   :  { %v1871_v7 = vpop.f32.mrf.mxu1  ;;  %v1831_v51 = vadd.f32 %v1830_v6, %v4086_v29  ;;  %v133_v6 = vrot.slane %v4095_v33, %v132_v18  ;;  %v3793_v33 = vld [vmem:[#allocation11 + $0x48] sm:$0xff]  }
 0x191   :  { %v1832_v17 = vpop.f32.mrf.mxu0 }
 0x192   :  { %v1873_v38 = vpop.f32.mrf.mxu1  ;;  %v1872_v40 = vadd.f32 %v1871_v7, %v1831_v51  ;;  %v1833_v36 = vadd.f32 %v1832_v17, %v1792_v47 }
 0x193   :  { %v1834_v41 = vpop.f32.mrf.mxu0 }
 0x194   :  { %v1875_v42 = vpop.f32.mrf.mxu1  ;;  %v2042_v31 = vadd.f32 %v1872_v40, %v121_v16  ;;  %v1874_v29 = vadd.f32 %v1873_v38, %v1833_v36 }
 0x195   :  { %v1835_v43 = vpop.f32.mrf.mxu0 }
 0x196   :  { %v1876_v44 = vpop.f32.mrf.mxu1  ;;  %vm2057_vm0 = vcmp.gt.f32.partialorder %v2042_v31, 0.0  ;;  %v2061_v46 = vmul.f32 0.2, %v2042_v31  ;;  %v2043_v48 = vadd.f32 %v1874_v29, %v125_v37  ;;  %v3794_v43 = vld [vmem:[#allocation11 + $0x8] sm:$0xff]  }
 0x198   :  { %v2062_v49 = vmul.f32 0.2, %v2043_v48  ;;  %vm2058_vm1 = vcmp.gt.f32.partialorder %v2043_v48, 0.0  ;;  %v2065_v52 = vsel %vm2057_vm0, %v2042_v31, %v2061_v46  ;;  %v3792_v31 = vld [vmem:[#allocation11 + $0x10] sm:$0xff]  }
 0x199   :  { %v2069_v56 = vpack.c.bf16 %v2065_v52, %v2065_v52  ;;  %v3798_v52 = vld [vmem:[#allocation12 + $0x30] sm:$0xff]  }
 0x19a   :  { %v2066_v54 = vsel %vm2058_vm1, %v2043_v48, %v2062_v49  ;;  %v3796_v48 = vld [vmem:[#allocation11] sm:$0xff]   ;;  %v3797_v49 = vld [vmem:[#allocation12 + $0x38] sm:$0xff]  }
 0x19b   :  { %v2070_v55 = vpack.c.bf16 %v2066_v54, %v2066_v54  ;;  %v3800_v54 = vld [vmem:[#allocation12 + $0x20] sm:$0xff]  }
 0x19d   :  { %2501 = vmatprep.mubr.bf16.mxu0 %v2070_v55  ;;  %v3801_v55 = vld [vmem:[#allocation12 + $0x18] sm:$0xff]  }
 0x19e   :  { %2502 = vmatmul.mubr.bf16.vlgmr.msra.gmra.mxu0 %v2069_v56  ;;  %v2137_v56 = vld [vmem:[%s4131_s4] sm:$0x3] }
 0x19f   :  { %3228 = vmatpush3.bf16.msra.mxu0 %v3782_v3 }
 0x1a0   :  { %3229 = vmatprep.subr.bf16.mxu0 %v3783_v4 }
 0x1a3   :  { %3230 = vmatpush3.bf16.msra.mxu0 %v3784_v5 }
 0x1a4   :  { %3231 = vmatprep.subr.bf16.mxu0 %v3785_v8 }
 0x1a7   :  { %3232 = vmatpush3.bf16.msra.mxu0 %v3786_v9 }
 0x1a8   :  { %3233 = vmatprep.subr.bf16.mxu0 %v3787_v10 }
 0x1ab   :  { %3234 = vmatpush3.bf16.msra.mxu0 %v3788_v11 }
 0x1ac   :  { %3235 = vmatprep.subr.bf16.mxu0 %v3789_v12  ;;  %v3201_v12 = vld [vmem:[%s4133_s6] ss:$0 sm:$0xff]  ;;  %s3973_s6 = smov [#allocation14]  }
 0x1ad   :  { %s2861_s23 = sshll.u32 %s3973_s6, 4  ;;  %s2862_s23 = int_to_ptr.vmem [resolvable:$true] %s2861_s23 }
 0x1ae   :  { %s3929_s24 = scalar_lea.vmem %s2862_s23, 128  ;;  %p3934_p3 = scmp.lt.s32.totalorder %s2862_s23, %s2862_s23 }
 0x1af   :  { %3236 = vmatpush3.bf16.msra.mxu0 %v3790_v13  ;;  %p3930_p2 = scmp.ne.s32.totalorder %s2862_s23, %s3929_s24  ;;  %p3935_p4 = scmp.lt.s32.totalorder %s3929_s24, %s3929_s24 }
 0x1b0   :  { %3237 = vmatprep.subr.bf16.mxu0 %v3791_v14 }
 0x1b1   :  { %p3936_p5 = por %p3935_p4, %p3934_p3 }
 0x1b3   :  { %3238 = vmatpush3.bf16.msra.mxu0 %v3792_v31  ;;  %p3937_p6 = pnand %p3936_p5, %p3930_p2 }
 0x1b4   :  { %3239 = vmatprep.subr.bf16.mxu0 %v3793_v33 }
 0x1b7   :  { %3240 = vmatpush3.bf16.msra.mxu0 %v3794_v43 }
 0x1b8   :  { %3241 = vmatprep.subr.bf16.mxu0 %v3795_v45 }
 0x1bb   :  { %3242 = vmatpush3.bf16.msra.mxu0 %v3796_v48 }
 0x1cf   :  { %v1912_v57 = vpop.f32.mrf.mxu0 }
 0x1d0   :  { %v1953_v58 = vpop.f32.mrf.mxu1 }
 0x1d1   :  { %v1954_v59 = vadd.f32 %v1953_v58, %v1912_v57  ;;  %v1914_v60 = vpop.f32.mrf.mxu0  ;;  %v2142_v57 = vrot.slane %v2137_v56, %v120_v30  ;;  %v2146_v58 = vrot.slane %v2137_v56, %v124_v34  ;;  %v3803_v30 = vld [vmem:[#allocation12 + $0x8] sm:$0xff]   ;;  %v3804_v34 = vld [vmem:[#allocation12] sm:$0xff]  }
 0x1d2   :  { %v1955_v61 = vpop.f32.mrf.mxu1 }
 0x1d3   :  { %v1916_v62 = vpop.f32.mrf.mxu0  ;;  %v1956_v21 = vadd.f32 %v1955_v61, %v1914_v60 }
 0x1d4   :  { %v1957_v63 = vpop.f32.mrf.mxu1 }
 0x1d5   :  { %v1917_v0 = vpop.f32.mrf.mxu0 }
 0x1d6   :  { %v1958_v1 = vpop.f32.mrf.mxu1 }
 0x20f   :  { %v1994_v19 = vpop.f32.mrf.mxu0 }
 0x210   :  { %v2035_v20 = vpop.f32.mrf.mxu1  ;;  %v1995_v22 = vadd.f32 %v1994_v19, %v1954_v59 }
 0x211   :  { %v1996_v24 = vpop.f32.mrf.mxu0 }
 0x212   :  { %v2037_v25 = vpop.f32.mrf.mxu1  ;;  %v2036_v26 = vadd.f32 %v2035_v20, %v1995_v22  ;;  %v1997_v28 = vadd.f32 %v1996_v24, %v1956_v21 }
 0x213   :  { %v1998_v7 = vpop.f32.mrf.mxu0 }
 0x214   :  { %v2039_v47 = vpop.f32.mrf.mxu1  ;;  %v2044_v51 = vadd.f32 %v2036_v26, %v129_v23  ;;  %v2038_v16 = vadd.f32 %v2037_v25, %v1997_v28  ;;  %v3218_v23 = vld [vmem:[%s4135_s8] ss:$0 sm:$0xff] }
 0x215   :  { %v1999_v35 = vpop.f32.mrf.mxu0 }
 0x216   :  { %v2040_v17 = vpop.f32.mrf.mxu1  ;;  %vm2059_vm2 = vcmp.gt.f32.partialorder %v2044_v51, 0.0  ;;  %v2063_v38 = vmul.f32 0.2, %v2044_v51  ;;  %v2045_v39 = vadd.f32 %v2038_v16, %v133_v6 }
 0x218   :  { %v2064_v40 = vmul.f32 0.2, %v2045_v39  ;;  %vm2060_vm3 = vcmp.gt.f32.partialorder %v2045_v39, 0.0  ;;  %v2067_v36 = vsel %vm2059_vm2, %v2044_v51, %v2063_v38 }
 0x219   :  { %v2071_v42 = vpack.c.bf16 %v2067_v36, %v2067_v36 }
 0x21a   :  { %v2068_v37 = vsel %vm2060_vm3, %v2045_v39, %v2064_v40 }
 0x21b   :  { %v2072_v41 = vpack.c.bf16 %v2068_v37, %v2068_v37 }
 0x21d   :  { %2542 = vmatprep.mubr.bf16.mxu1 %v2072_v41 }
 0x21e   :  { %2543 = vmatmul.mubr.bf16.vlgmr.msra.gmra.mxu1 %v2071_v42 }
 0x21f   :  { %3259 = vmatpush3.bf16.msra.mxu1 %v3797_v49  ;;  %3274 = vmatprep.mubr.msk.bf16.mxu1 %vm3972_vm6, %v3971_v50 }
 0x220   :  { %3260 = vmatprep.subr.bf16.mxu1 %v3971_v50 }
 0x223   :  { %3261 = vmatpush3.bf16.msra.mxu1 %v3798_v52 }
 0x224   :  { %3262 = vmatprep.subr.bf16.mxu1 %v3971_v50 }
 0x227   :  { %3263 = vmatpush3.bf16.msra.mxu1 %v3799_v53 }
 0x228   :  { %3264 = vmatprep.subr.bf16.mxu1 %v3971_v50 }
 0x22b   :  { %3265 = vmatpush3.bf16.msra.mxu1 %v3800_v54 }
 0x22c   :  { %3266 = vmatprep.subr.bf16.mxu1 %v3971_v50 }
 0x22f   :  { %3267 = vmatpush3.bf16.msra.mxu1 %v3801_v55 }
 0x230   :  { %3268 = vmatprep.subr.bf16.mxu1 %v3971_v50 }
 0x233   :  { %3269 = vmatpush3.bf16.msra.mxu1 %v3802_v27 }
 0x234   :  { %3270 = vmatprep.subr.bf16.mxu1 %v3971_v50 }
 0x237   :  { %3271 = vmatpush3.bf16.msra.mxu1 %v3803_v30 }
 0x238   :  { %3272 = vmatprep.subr.bf16.mxu1 %v3971_v50 }
 0x23b   :  { %3273 = vmatpush3.bf16.msra.mxu1 %v3804_v34 }
 0x25e   :  { %v2503_v29 = vpop.f32.mrf.mxu0 }
 0x25f   :  { %v2504_v59 = vadd.f32 %v2503_v29, %v2142_v57 }
 0x260   :  { %v2505_v32 = vpop.f32.mrf.mxu0 }
 0x261   :  { %v2506_v61 = vadd.f32 %v2505_v32, %v2146_v58 }
 0x262   :  { %v2507_v44 = vpop.f32.mrf.mxu0 }
 0x264   :  { %v2508_v46 = vpop.f32.mrf.mxu0 }
 0x2de   :  { %v2544_v60 = vpop.f32.mrf.mxu1 }
 0x2df   :  { %v2545_v62 = vadd.f32 %v2544_v60, %v2504_v59 }
 0x2e0   :  { %v2546_v63 = vpop.f32.mrf.mxu1 }
 0x2e1   :  { %vm2551_vm4 = vcmp.gt.f32.partialorder %v2545_v62, 0.0  ;;  %v2553_v0 = vmul.f32 0.2, %v2545_v62  ;;  %v2547_v1 = vadd.f32 %v2546_v63, %v2506_v61 }
 0x2e2   :  { %v2548_v2 = vpop.f32.mrf.mxu1 }
 0x2e3   :  { %vm2552_vm5 = vcmp.gt.f32.partialorder %v2547_v1, 0.0  ;;  %v2554_v3 = vmul.f32 0.2, %v2547_v1  ;;  %v2555_v4 = vsel %vm2551_vm4, %v2545_v62, %v2553_v0 }
 0x2e4   :  { %v2549_v5 = vpop.f32.mrf.mxu1  ;;  %v2557_v10 = vpack.c.bf16 %v2555_v4, %v2555_v4 }
 0x2e5   :  { %v2556_v8 = vsel %vm2552_vm5, %v2547_v1, %v2554_v3 }
 0x2e6   :  { %v2558_v9 = vpack.c.bf16 %v2556_v8, %v2556_v8 }
 0x2e8   :  { %2726 = vmatprep.mubr.bf16.mxu0 %v2558_v9 }
 0x2e9   :  { %2727 = vmatmul.mubr.bf16.vlgmr.msra.gmra.mxu0 %v2557_v10 }
 0x3a9   :  { %v3243_v11 = vpop.f32.mrf.mxu0 }
 0x3ab   :  { %v3244_v13 = vpop.f32.mrf.mxu0 }
 0x3ac   :  { %v3245_v14 = vadd.f32 %v3244_v13, %v3243_v11 }
 0x3ad   :  { %v3246_v15 = vpop.f32.mrf.mxu0 }
 0x3ae   :  { %v2729_v18 = vadd.f32 %v3245_v14, %v3201_v12 }
 0x3af   :  { %v3247_v19 = vpop.f32.mrf.mxu0 }
 0x3b0   :  { %vm2734_vm7 = vcmp.gt.f32.partialorder %v2729_v18, 0.0  ;;  %v2735_v20 = vmul.f32 0.2, %v2729_v18 }
 0x3b2   :  { %v2736_v21 = vsel %vm2734_vm7, %v2729_v18, %v2735_v20 }
 0x3b3   :  { %v2737_v22 = vpack.c.bf16 %v2736_v21, %v2736_v21 }
 0x3b5   :  { %3275 = vmatmul.mubr.bf16.vlgmr.msra.gmra.mxu1 %v2737_v22 }
 0x475   :  { %v2843_v24 = vpop.f32.mrf.mxu1 }
 0x476   :  { %v2844_v25 = vadd.f32 %v3218_v23, %v2843_v24 }
 0x477   :  { %v3276_v26 = vpop.f32.mrf.mxu1 }
 0x478   :  { %v2849_v28 = vsub.f32 0.0, %v2844_v25 }
 0x479   :  { %v2846_v6 = vpop.f32.mrf.mxu1 }
 0x47a   :  { %v2850_v7 = vmul.f32 1.442695, %v2849_v28 }
 0x47b   :  { %v3277_v47 = vpop.f32.mrf.mxu1 }
 0x47c   :  { %3805 = vpow2.f32 %v2850_v7 }
 0x489   :  { %v3806_v51 = vpop.eup %3805 }
 0x48a   :  { %v2852_v16 = vadd.f32 1.0, %v3806_v51 }
 0x48c   :  { %3807 = vrcp.f32 %v2852_v16 }
 0x499   :  { %v3808_v35 = vpop.eup %3807 }
 0x49a   :  { %2854 = vst [vmem:[#allocation14] sm:$0xff] %v3808_v35 }
 0x49b   :  { %3940 = shalt.err (!%p3937_p6)
}
 0x49c   :  { %2864 = dma.vmem_to_hbm [thread:$0]  %s2862_s23, 128, %s4136_s9, [#allocation5]  }
 0x49d   :  { %3957 = dma.done.wait [#allocation5], 128  }
 0x49e   :  { %3958 = vsyncadd [#allocation5], 4294967168 }
 0x49f   :  { %2868 = vsyncpa [#allocation4], 1 }
 0x4a0   :  { %2869 = vsyncpa [#allocation7], 1 }
 0x4a1   :  { %2870 = vsyncpa [#allocation10], 1 }
 0x4a2   :  { %2871 = vsyncpa [#allocation13], 1 }
 0x4a3   :  { %2872 = vsyncpa [#allocation5], 1 }

</bundles_post_ra>
